<compile_context>
chip_gen: v5e
topology: v5e:2x2
jax: 0.10.0
libtpu: 0.0.40
codegen_flags: <defaults>
</compile_context>

<pallas_src>
import functools
import re

import jax
import jax.numpy as jnp
from jax.experimental import pallas as pl
from jax.experimental.pallas import tpu as pltpu

LEAKY_ALPHA = 0.2          # nn.LeakyReLU(alpha=0.2)
MASK_VALUE = -1e30         # "no edge" score (finite, representable in bf16)


def _tpu_generation():
    """Best-effort TPU generation (5, 6, 7, ...) from the device kind string."""
    try:
        kind = jax.devices()[0].device_kind.lower()
    except Exception:
        return 0
    m = re.search(r"(\d+)", kind)
    return int(m.group(1)) if m else 0


def _gat_kernel(s_l_ref, s_r_ref, adj_ref, h_ref, out_ref, m_sc, acc_sc,
                *, fout, exp_dtype):
    ki = pl.program_id(1)

    # ---- per row-block init (new query tile) --------------------------------
    @pl.when(ki == 0)
    def _():
        m_sc[...] = jnp.full_like(m_sc, MASK_VALUE)
        acc_sc[...] = jnp.zeros_like(acc_sc)

    # ---- attention scores for this (bq, bk) tile -----------------------------
    e = s_l_ref[...] + s_r_ref[...]                   # (bq,1)+(1,bk) -> (bq,bk)
    e = jnp.maximum(e, LEAKY_ALPHA * e)               # LeakyReLU
    e = jnp.where(adj_ref[...] != 0, e, MASK_VALUE)   # mask non-edges (only N^2 select)

    # ---- online softmax update ------------------------------------------------
    m_prev = m_sc[...]
    m_new = jnp.maximum(m_prev, jnp.max(e, axis=1, keepdims=True))    # (bq,1)
    alpha = jnp.exp(m_prev - m_new)                                   # (bq,1) f32
    # exp in exp_dtype (bf16 on v6e/v7x: ~2x EUP rate; f32 on v5e).
    # Masked entries have e - m_new ~= -1e30 (also in bf16) and exp to exact 0
    # once the row has seen a real edge.  Rows with NO edge so far have
    # e == m_new == MASK, so p == 1 junk accumulates; it is wiped either by
    # alpha == 0 when a real edge appears, or by the final empty-row zeroing.
    p = jnp.exp((e - m_new).astype(exp_dtype))                        # (bq,bk)
    # Single MXU matmul: last column of h_aug is all ones, so acc[:, fout]
    # accumulates the softmax denominator with f32 accumulation.
    acc_sc[...] = alpha * acc_sc[...] + jnp.dot(
        p.astype(h_ref.dtype), h_ref[...], preferred_element_type=jnp.float32)
    m_sc[...] = m_new

    # ---- finalize --------------------------------------------------------------
    @pl.when(ki == pl.num_programs(1) - 1)
    def _():
        acc = acc_sc[...]
        denom = acc[:, fout:fout + 1] + 1e-16
        inv = pl.reciprocal(denom, approx=True)        # EUP slot (nearly free)
        inv = inv * (2.0 - denom * inv)                # Newton step -> ~f32 accuracy
        # Rows with no edges at all keep m == MASK_VALUE; zero them (matches
        # spmm on an empty row).  The 0.5*MASK_VALUE threshold could only
        # misfire if a legitimate row max ever reached ~-5e29 (impossible).
        inv = jnp.where(m_sc[...] > 0.5 * MASK_VALUE, inv, 0.0)
        out_ref[...] = (acc[:, :fout] * inv).astype(out_ref.dtype)


def _round_up(v, m):
    return (v + m - 1) // m * m


def preprocess_adjacency(adj, n_pad=None):
    """Pad + convert adjacency to int8 once.  Cache this for static graphs to
    avoid the O(N^2) f32->int8 conversion traffic on every forward."""
    n = adj.shape[0]
    n_pad = _round_up(n, 128) if n_pad is None else n_pad
    adj_i8 = (adj != 0).astype(jnp.int8)
    if n_pad != n:
        adj_i8 = jnp.pad(adj_i8, ((0, n_pad - n), (0, n_pad - n)))
    return adj_i8


def _pick_tile(requested, n_pad, cap=None):
    t = min(requested, n_pad)
    if cap is not None:
        t = min(t, cap)
    t = max(128, t // 128 * 128)
    while n_pad % t:            # n_pad is a multiple of 128 -> terminates at 128
        t -= 128
    return t


def gat_one_head_forward(x, adj, weight, a, *, block_q=512, block_k=1024,
                         matmul_dtype=jnp.bfloat16, exp_dtype=None):
    n, fin = x.shape
    fout = weight.shape[1]
    assert a.shape == (1, 2 * fout)

    gen = _tpu_generation()
    if exp_dtype is None:
        # bf16 EUP/VPU exists on v6e and newer; keep f32 elementwise on v5e.
        exp_dtype = jnp.bfloat16 if gen >= 6 else jnp.float32

    n_pad = _round_up(n, 128)

    # Accept a pre-padded int8/bool adjacency (static-graph cache path); else
    # convert here.
    if adj.dtype in (jnp.int8, jnp.bool_) and adj.shape == (n_pad, n_pad):
        adj_i8 = adj.astype(jnp.int8)
    else:
        assert adj.shape == (n, n)
        adj_i8 = preprocess_adjacency(adj, n_pad)

    # ---- hoisted prologue: tiny XLA ops, computed once per call --------------
    x_p = jnp.pad(x, ((0, n_pad - n), (0, 0))) if n_pad != n else x
    h = jnp.dot(x_p, weight, preferred_element_type=jnp.float32)       # (n_pad, fout)
    a32 = a.astype(jnp.float32)
    s_l = jnp.dot(h, a32[:, :fout].T)                                  # (n_pad, 1)
    s_r = jnp.dot(a32[:, fout:], h.T)                                  # (1, n_pad)
    # Ones column: the softmax denominator rides the MXU for free.
    h_aug = jnp.concatenate([h, jnp.ones((n_pad, 1), h.dtype)],
                            axis=1).astype(matmul_dtype)               # (n_pad, fout+1)
    fout_aug = fout + 1

    # ---- tiling (generation aware) --------------------------------------------
    cap_q = None
    if gen >= 7 and n_pad >= 256:
        # v7x has 2 TensorCores: keep >=2 steps on the "parallel" row-block axis.
        cap_q = max(128, (n_pad // 2) // 128 * 128)
    bq = _pick_tile(block_q, n_pad, cap_q)
    bk = _pick_tile(block_k, n_pad)
    # 64 MiB scoped VMEM on 128-MiB parts (v5e/v6e); stay at 48 MiB otherwise
    # (v7x has only 64 MiB physical VMEM per TensorCore).
    vmem_limit = (64 if gen in (5, 6) else 48) * 1024 * 1024

    grid = (n_pad // bq, n_pad // bk)
    kernel = functools.partial(_gat_kernel, fout=fout, exp_dtype=exp_dtype)

    out = pl.pallas_call(
        kernel,
        out_shape=jax.ShapeDtypeStruct((n_pad, fout), jnp.float32),
        grid_spec=pltpu.PrefetchScalarGridSpec(
            num_scalar_prefetch=0,
            grid=grid,
            in_specs=[
                pl.BlockSpec((bq, 1), lambda qi, ki: (qi, 0)),           # s_l (rows)
                pl.BlockSpec((1, bk), lambda qi, ki: (0, ki)),           # s_r (cols)
                pl.BlockSpec((bq, bk), lambda qi, ki: (qi, ki)),         # adj tile (int8)
                pl.BlockSpec((bk, fout_aug), lambda qi, ki: (ki, 0)),    # h + ones column
            ],
            out_specs=pl.BlockSpec((bq, fout), lambda qi, ki: (qi, 0)),
            scratch_shapes=[
                pltpu.VMEM((bq, 1), jnp.float32),          # running row max
                pltpu.VMEM((bq, fout_aug), jnp.float32),   # augmented accumulator
            ]),
        compiler_params=pltpu.CompilerParams(
            # row-blocks independent (megacore on v7x); column sweep is the
            # reduction axis -> last, "arbitrary".
            dimension_semantics=("parallel", "arbitrary"),
            vmem_limit_bytes=vmem_limit),
    )(s_l, s_r, adj_i8, h_aug)

    return out[:n] if n_pad != n else out


def _reference_forward(x, adj, weight, a):
    """Pure-JAX dense reference (same math), for a silent correctness check."""
    fout = weight.shape[1]
    h = x @ weight
    s_l = h @ a[:, :fout].T
    s_r = h @ a[:, fout:].T
    e = s_l + s_r.T
    e = jnp.where(e > 0, e, LEAKY_ALPHA * e)
    mask = adj != 0
    e_masked = jnp.where(mask, e, -1e30)
    row_max = jnp.max(e_masked, axis=1, keepdims=True)
    ex = jnp.where(mask, jnp.exp(e - row_max), 0.0)
    att = ex / (jnp.sum(ex, axis=1, keepdims=True) + 1e-16)
    return att @ h


if __name__ == "__main__":
    # Small shapes consistent with the module: N nodes, in/out feature dims.
    N, IN_FEATURES, OUT_FEATURES = 256, 16, 32

    key = jax.random.PRNGKey(0)
    k_x, k_adj, k_w, k_a = jax.random.split(key, 4)

    x = jax.random.normal(k_x, (N, IN_FEATURES), dtype=jnp.float32)

    # deterministic sparse binary adjacency with self-loops; two isolated
    # source rows exercise the empty-row (zero-output) path.
    adj = (jax.random.uniform(k_adj, (N, N)) < 0.05).astype(jnp.float32)
    adj = jnp.maximum(adj, jnp.eye(N, dtype=jnp.float32))
    adj = adj.at[3].set(0.0).at[200].set(0.0)

    # xavier_normal_ with gain = calculate_gain('relu') = sqrt(2)
    gain = jnp.sqrt(2.0)
    w_std = gain * jnp.sqrt(2.0 / (IN_FEATURES + OUT_FEATURES))
    a_std = gain * jnp.sqrt(2.0 / (1 + 2 * OUT_FEATURES))
    weight = w_std * jax.random.normal(k_w, (IN_FEATURES, OUT_FEATURES), dtype=jnp.float32)
    a = a_std * jax.random.normal(k_a, (1, 2 * OUT_FEATURES), dtype=jnp.float32)

    ref = _reference_forward(x, adj, weight, a)

    # 1) Strict f32 path, forced 128x128 tiles -> (2, 2) grid exercises the
    #    online softmax and the per-row-block init/finalize branches.
    out_f32 = jax.block_until_ready(
        gat_one_head_forward(x, adj, weight, a, block_q=128, block_k=128,
                             matmul_dtype=jnp.float32, exp_dtype=jnp.float32))
    assert out_f32.shape == (N, OUT_FEATURES)
    assert jnp.allclose(out_f32, ref, atol=1e-3, rtol=1e-3)
    assert jnp.all(out_f32[3] == 0.0) and jnp.all(out_f32[200] == 0.0)

    # 2) Default fast path (bf16 MXU matmul, generation-dependent exp dtype,
    #    large tiles) with the cached preprocessed int8 adjacency (static graph).
    adj_cached = preprocess_adjacency(adj)
    out_fast = jax.block_until_ready(
        gat_one_head_forward(x, adj_cached, weight, a))
    assert out_fast.shape == (N, OUT_FEATURES)
    assert jnp.allclose(out_fast, ref, atol=5e-2, rtol=5e-2)
    assert jnp.all(out_fast[3] == 0.0) and jnp.all(out_fast[200] == 0.0)

    print("KERNEL_OK")
</pallas_src>

<mosaic_0001>
module attributes {stable_mosaic.version = 11 : i64} {
  func.func @_gat_kernel(%arg0: i32, %arg1: i32, %arg2: memref<128x1xf32, #tpu.memory_space<vmem>>, %arg3: memref<1x128xf32, #tpu.memory_space<vmem>>, %arg4: memref<128x128xi8, #tpu.memory_space<vmem>>, %arg5: memref<128x33xf32, #tpu.memory_space<vmem>>, %arg6: memref<128x32xf32, #tpu.memory_space<vmem>>, %arg7: memref<128x1xf32, #tpu.memory_space<vmem>>, %arg8: memref<128x33xf32, #tpu.memory_space<vmem>>) attributes {dimension_semantics = [#tpu.dimension_semantics<parallel>, #tpu.dimension_semantics<arbitrary>], iteration_bounds = array<i64: 2, 2>, scalar_prefetch = 0 : i64, scratch_operands = 2 : i64, tpu.core_type = #tpu.core_type<tc>, window_params = [{transform_indices = @transform_0, window_bounds = array<i64: 128, 1>}, {transform_indices = @transform_1, window_bounds = array<i64: 1, 128>}, {transform_indices = @transform_2, window_bounds = array<i64: 128, 128>}, {transform_indices = @transform_3, window_bounds = array<i64: 128, 33>}, {transform_indices = @transform_4, window_bounds = array<i64: 128, 32>}]} {
    %c0_i32 = arith.constant 0 : i32
    %0 = arith.cmpi eq, %arg1, %c0_i32 : i32
    %1 = arith.extui %0 : i1 to i32
    %c0_i32_0 = arith.constant 0 : i32
    %2 = arith.cmpi ne, %1, %c0_i32_0 : i32
    scf.if %2 {
      %cst_20 = arith.constant -1.000000e+30 : f32
      %36 = vector.broadcast %cst_20 : f32 to vector<128x1xf32>
      %c0_21 = arith.constant 0 : index
      %c0_22 = arith.constant 0 : index
      %37 = vector.load %arg7[%c0_21, %c0_22] : memref<128x1xf32, #tpu.memory_space<vmem>>, vector<128x1xf32>
      tpu.vector_store %arg7[%c0_21, %c0_22], %36 {strides = array<i32>} : memref<128x1xf32, #tpu.memory_space<vmem>>, vector<128x1xf32>,
      %cst_23 = arith.constant 0.000000e+00 : f32
      %38 = vector.broadcast %cst_23 : f32 to vector<128x33xf32>
      %c0_24 = arith.constant 0 : index
      %c0_25 = arith.constant 0 : index
      %39 = vector.load %arg8[%c0_24, %c0_25] : memref<128x33xf32, #tpu.memory_space<vmem>>, vector<128x33xf32>
      tpu.vector_store %arg8[%c0_24, %c0_25], %38 {strides = array<i32>} : memref<128x33xf32, #tpu.memory_space<vmem>>, vector<128x33xf32>,
    } else {
    }
    %c0 = arith.constant 0 : index
    %c0_1 = arith.constant 0 : index
    %3 = vector.load %arg2[%c0, %c0_1] : memref<128x1xf32, #tpu.memory_space<vmem>>, vector<128x1xf32>
    %c0_2 = arith.constant 0 : index
    %c0_3 = arith.constant 0 : index
    %4 = vector.load %arg3[%c0_2, %c0_3] : memref<1x128xf32, #tpu.memory_space<vmem>>, vector<1x128xf32>
    %5 = vector.broadcast %3 : vector<128x1xf32> to vector<128x128xf32>
    %6 = vector.broadcast %4 : vector<1x128xf32> to vector<128x128xf32>
    %7 = arith.addf %5, %6 : vector<128x128xf32>
    %cst = arith.constant 2.000000e-01 : f32
    %8 = vector.broadcast %cst : f32 to vector<128x128xf32>
    %9 = arith.mulf %8, %7 : vector<128x128xf32>
    %10 = arith.maximumf %7, %9 : vector<128x128xf32>
    %c0_4 = arith.constant 0 : index
    %c0_5 = arith.constant 0 : index
    %11 = vector.load %arg4[%c0_4, %c0_5] : memref<128x128xi8, #tpu.memory_space<vmem>>, vector<128x128xi8>
    %c0_i8 = arith.constant 0 : i8
    %12 = vector.broadcast %c0_i8 : i8 to vector<128x128xi8>
    %13 = arith.cmpi ne, %11, %12 : vector<128x128xi8>
    %cst_6 = arith.constant -1.000000e+30 : f32
    %14 = vector.broadcast %cst_6 : f32 to vector<128x128xf32>
    %15 = arith.select %13, %10, %14 : vector<128x128xi1>, vector<128x128xf32>
    %c0_7 = arith.constant 0 : index
    %c0_8 = arith.constant 0 : index
    %16 = vector.load %arg7[%c0_7, %c0_8] : memref<128x1xf32, #tpu.memory_space<vmem>>, vector<128x1xf32>
    %cst_9 = arith.constant dense<0xFF800000> : vector<128xf32>
    %17 = vector.multi_reduction <maximumf>, %15, %cst_9 [1] : vector<128x128xf32> to vector<128xf32>
    %18 = vector.shape_cast %17 : vector<128xf32> to vector<128x1xf32>
    %19 = arith.maximumf %16, %18 : vector<128x1xf32>
    %20 = arith.subf %16, %19 : vector<128x1xf32>
    %21 = math.exp %20 : vector<128x1xf32>
    %22 = vector.broadcast %19 : vector<128x1xf32> to vector<128x128xf32>
    %23 = arith.subf %15, %22 : vector<128x128xf32>
    %24 = math.exp %23 : vector<128x128xf32>
    %c0_10 = arith.constant 0 : index
    %c0_11 = arith.constant 0 : index
    %25 = vector.load %arg8[%c0_10, %c0_11] : memref<128x33xf32, #tpu.memory_space<vmem>>, vector<128x33xf32>
    %26 = vector.broadcast %21 : vector<128x1xf32> to vector<128x33xf32>
    %27 = arith.mulf %26, %25 : vector<128x33xf32>
    %c0_12 = arith.constant 0 : index
    %c0_13 = arith.constant 0 : index
    %28 = vector.load %arg5[%c0_12, %c0_13] : memref<128x33xf32, #tpu.memory_space<vmem>>, vector<128x33xf32>
    %cst_14 = arith.constant dense<0.000000e+00> : vector<128x33xf32>
    %29 = tpu.matmul %24, %28, %cst_14 {dimension_numbers = #tpu.dot_dimension_numbers<[1], [0], [0], [1], [0, 0, 1, 1], [], []>} : vector<128x128xf32>, vector<128x33xf32>, vector<128x33xf32> -> vector<128x33xf32>
    %30 = arith.addf %27, %29 : vector<128x33xf32>
    %c0_15 = arith.constant 0 : index
    %c0_16 = arith.constant 0 : index
    %31 = vector.load %arg8[%c0_15, %c0_16] : memref<128x33xf32, #tpu.memory_space<vmem>>, vector<128x33xf32>
    tpu.vector_store %arg8[%c0_15, %c0_16], %30 {strides = array<i32>} : memref<128x33xf32, #tpu.memory_space<vmem>>, vector<128x33xf32>,
    %c0_17 = arith.constant 0 : index
    %c0_18 = arith.constant 0 : index
    %32 = vector.load %arg7[%c0_17, %c0_18] : memref<128x1xf32, #tpu.memory_space<vmem>>, vector<128x1xf32>
    tpu.vector_store %arg7[%c0_17, %c0_18], %19 {strides = array<i32>} : memref<128x1xf32, #tpu.memory_space<vmem>>, vector<128x1xf32>,
    %c1_i32 = arith.constant 1 : i32
    %33 = arith.cmpi eq, %arg1, %c1_i32 : i32
    %34 = arith.extui %33 : i1 to i32
    %c0_i32_19 = arith.constant 0 : i32
    %35 = arith.cmpi ne, %34, %c0_i32_19 : i32
    scf.if %35 {
      %c0_20 = arith.constant 0 : index
      %c0_21 = arith.constant 0 : index
      %36 = vector.load %arg8[%c0_20, %c0_21] : memref<128x33xf32, #tpu.memory_space<vmem>>, vector<128x33xf32>
      %37 = vector.extract_strided_slice %36 {offsets = [0, 32], sizes = [128, 1], strides = [1, 1]} : vector<128x33xf32> to vector<128x1xf32>
      %cst_22 = arith.constant 1.000000e-16 : f32
      %38 = vector.broadcast %cst_22 : f32 to vector<128x1xf32>
      %39 = arith.addf %37, %38 : vector<128x1xf32>
      %40 = tpu.reciprocal %39 {approx = true} : vector<128x1xf32> -> vector<128x1xf32>
      %41 = arith.mulf %39, %40 : vector<128x1xf32>
      %cst_23 = arith.constant 2.000000e+00 : f32
      %42 = vector.broadcast %cst_23 : f32 to vector<128x1xf32>
      %43 = arith.subf %42, %41 : vector<128x1xf32>
      %44 = arith.mulf %40, %43 : vector<128x1xf32>
      %c0_24 = arith.constant 0 : index
      %c0_25 = arith.constant 0 : index
      %45 = vector.load %arg7[%c0_24, %c0_25] : memref<128x1xf32, #tpu.memory_space<vmem>>, vector<128x1xf32>
      %cst_26 = arith.constant -5.000000e+29 : f32
      %46 = vector.broadcast %cst_26 : f32 to vector<128x1xf32>
      %47 = arith.cmpf ogt, %45, %46 : vector<128x1xf32>
      %cst_27 = arith.constant 0.000000e+00 : f32
      %48 = vector.broadcast %cst_27 : f32 to vector<128x1xf32>
      %49 = arith.select %47, %44, %48 : vector<128x1xi1>, vector<128x1xf32>
      %50 = vector.extract_strided_slice %36 {offsets = [0, 0], sizes = [128, 32], strides = [1, 1]} : vector<128x33xf32> to vector<128x32xf32>
      %51 = vector.broadcast %49 : vector<128x1xf32> to vector<128x32xf32>
      %52 = arith.mulf %50, %51 : vector<128x32xf32>
      %c0_28 = arith.constant 0 : index
      %c0_29 = arith.constant 0 : index
      %53 = vector.load %arg6[%c0_28, %c0_29] : memref<128x32xf32, #tpu.memory_space<vmem>>, vector<128x32xf32>
      tpu.vector_store %arg6[%c0_28, %c0_29], %52 {strides = array<i32>} : memref<128x32xf32, #tpu.memory_space<vmem>>, vector<128x32xf32>,
    } else {
    }
    return
  }
  func.func @transform_0(%arg0: i32, %arg1: i32) -> (i32, i32) {
    %c0_i32 = arith.constant 0 : i32
    %c0_i32_0 = arith.constant 0 : i32
    return %arg0, %c0_i32 : i32, i32
  }
  func.func @transform_1(%arg0: i32, %arg1: i32) -> (i32, i32) {
    %c0_i32 = arith.constant 0 : i32
    %c0_i32_0 = arith.constant 0 : i32
    return %c0_i32, %arg1 : i32, i32
  }
  func.func @transform_2(%arg0: i32, %arg1: i32) -> (i32, i32) {
    %c0_i32 = arith.constant 0 : i32
    return %arg0, %arg1 : i32, i32
  }
  func.func @transform_3(%arg0: i32, %arg1: i32) -> (i32, i32) {
    %c0_i32 = arith.constant 0 : i32
    %c0_i32_0 = arith.constant 0 : i32
    return %arg1, %c0_i32 : i32, i32
  }
  func.func @transform_4(%arg0: i32, %arg1: i32) -> (i32, i32) {
    %c0_i32 = arith.constant 0 : i32
    %c0_i32_0 = arith.constant 0 : i32
    return %arg0, %c0_i32 : i32, i32
  }
}

</mosaic_0001>

<bundles_post_ra>
// kernel: tpu_custom_call.1
= control target key start
LH: loop header
LB: loop body
LE: loop exit
PB: predicated region body
PF: predicated region fallthrough
CT: control target
= control target key end

     0   :  { %s1886_s15 = smov 0   ;;  %s1888_s16 = smov 0   ;;  %s2488_s0 = inlined_call_operand.vmem [shape: f32[256,1], index: 0, kind: input, shape index: {}]   ;;  %s2489_s1 = inlined_call_operand.vmem [shape: f32[1,256], index: 1, kind: input, shape index: {}]   ;;  %s2490_s2 = inlined_call_operand.vmem [shape: s8[256,256], index: 2, kind: input, shape index: {}]   ;;  %s2491_s3 = inlined_call_operand.vmem [shape: f32[256,33], index: 3, kind: input, shape index: {}]   ;;  %s2492_s4 = inlined_call_operand.vmem [shape: f32[256,32], index: 4, kind: output, shape index: {}]  }
   0x1   :  { %s1890_s17 = smov 0   ;;  %s1892_s18 = smov 0  }
   0x2   :  { %s1894_s19 = smov 0   ;;  %s1896_s20 = smov 0  }
   0x3   :  { %s1898_s21 = smov 0  }
   0x4 LB: > { %s23_s22 = sadd.s32 1, %s1846_s19  ;;  %s26_s23 = sadd.s32 1, %s1850_s20  ;;  %s1854_s21 = sphi %s1898_s21, %s14_s21   ;;  %s1850_s20 = sphi %s1896_s20, %s2504_s20   ;;  %s1846_s19 = sphi %s1894_s19, %s2503_s19   ;;  %s1842_s18 = sphi %s1892_s18, %s2502_s18   ;;  %s1838_s17 = sphi %s1890_s17, %s2501_s17   ;;  %s1834_s16 = sphi %s1888_s16, %s2500_s16   ;;  %s1830_s15 = sphi %s1886_s15, %s2499_s15  }
   0x5   : > { %p24_p0 = scmp.ge.s32.totalorder %s23_s22, 2  ;;  %p94_p1 = scmp.ne.s32.totalorder %s1834_s16, %s1830_s15 }
   0x6   : > { %p95_p2 = scmp.eq.s32.totalorder %s1854_s21, 0  ;;  %s87_s27 = sadd.s32 1, %s1834_s16 }
   0x7   : > { %s2506_s22 = smov (%p24_p0, %s23_s22), 0  ;;  %s2508_s23 = smov (!%p24_p0, %s26_s23), %s1850_s20 }
   0x8   : > { %p96_p3 = por %p95_p2, %p94_p1  ;;  %p28_p4 = scmp.ge.s32.totalorder %s2508_s23, 2 }
   0x9   : > { %s83_s24 = ssub.s32 %s1846_s19, %s2506_s22  ;;  %p1570_p6 = scmp.ge.s32.totalorder %s1854_s21, 4 }
   0xa   : > { %s2510_s23 = smov (%p28_p4, %s2508_s23), 0 }
   0xb   : > { %s82_s25 = ssub.s32 %s1850_s20, %s2510_s23  ;;  %172 = sbr.rel (%p1570_p6) target bundleno = 26 (0x1a), region = 16 }
   0xc   : > { %s84_s26 = sor.u32 %s83_s24, %s82_s25 }
   0xd   : > { %p85_p5 = scmp.eq.s32.totalorder %s84_s26, 0 }
   0xf   : > { %s1937_s28 = scalar_select %p85_p5, %s1834_s16, %s87_s27  }
  0x10   : > { %190 = sbr.rel (!%p96_p3) target bundleno = 26 (0x1a), region = 28  ;;  %s192_s29 = sand.u32 (%p96_p3), 1, %s1834_s16  }
  0x11   : > { %s1587_s30 = sshll.u32 (%p96_p3), %s1850_s20, 3  ;;  %s1571_s5 = sshll.u32 (%p96_p3), %s192_s29, 5 }
  0x12   : > { %s197_s6 = sadd.s32 (%p96_p3), %s1846_s19, %s1587_s30  ;;  %s194_s11 = scalar_lea.vmem (%p96_p3), [#allocation4], %s1571_s5 }
  0x13   : > { %s1574_s7 = sshll.u32 (%p96_p3), %s197_s6, 3 }
  0x14   : > { %s199_s10 = scalar_lea.vmem (%p96_p3), %s2490_s2, %s1574_s7 }
  0x15   : > { %v234_v0 = vld [vmem:[%s199_s10] sm:$0xff]  ;;  %v236_v1 = vld [vmem:[%s199_s10 + $0x10] sm:$0xff] }
  0x16   : > { %v238_v2 = vld [vmem:[%s199_s10 + $0x20] sm:$0xff]  ;;  %235 = vst [vmem:[%s194_s11] sm:$0xff] %v234_v0  ;;  %v240_v3 = vld [vmem:[%s199_s10 + $0x30] sm:$0xff] }
  0x17   : > { %237 = vst [vmem:[%s194_s11 + $0x8] sm:$0xff] %v236_v1 }
  0x18   : > { %239 = vst [vmem:[%s194_s11 + $0x10] sm:$0xff] %v238_v2 }
  0x19   : > { %241 = vst [vmem:[%s194_s11 + $0x18] sm:$0xff] %v240_v3 }
  0x1a PF: > { %p1575_p7 = scmp.ge.s32.totalorder %s1854_s21, 1  ;;  %p255_p8 = scmp.lt.s32.totalorder %s1854_s21, 5 }
  0x1c   : > { %p256_p9 = pnand %p1575_p7, %p255_p8 }
  0x1d   : > { %s262_s12 = sand.u32 (!%p256_p9), 1, %s1830_s15   ;;  %s1577_s13 = sshll.u32 (!%p256_p9), %s1842_s18, 4 }
  0x1e   : > { %259 = sbr.rel (%p256_p9) target bundleno = 923 (0x39b), region = 70  ;;  %s1576_s14 = sshll.u32 (!%p256_p9), %s262_s12, 5 }
  0x1f   : > { %p301_p10 = scmp.lt.s32.totalorder (!%p256_p9), %s1577_s13, 31  ;;  %p306_p11 = scmp.lt.s32.totalorder (!%p256_p9), %s1838_s17, 1 }
  0x20   : > { %s1579_s26 = sshll.u32 (!%p256_p9), %s1838_s17, 4  ;;  %p1583_p13 = scmp.ne.s32.totalorder (!%p256_p9), %s1838_s17, 0 }
  0x21   : > { %p311_p12 = scmp.lt.s32.totalorder (!%p256_p9), %s1579_s26, 31 }
  0x23   : > { %s2512_s13 = smov (!%p301_p10, %s1577_s13), 31  ;;  %s2514_s26 = smov (!%p311_p12, %s1579_s26), 31 }
  0x24   : > { %s1952_s24 = scalar_select %p306_p11, %s1838_s17, 1 }
  0x25   : > { %s1578_s25 = sshll.u32 %s2512_s13, 3  ;;  %s1580_s9 = sshll.u32 %s2514_s26, 3 }
  0x26   : > { %s1958_s30 = scalar_lea.vmem %s2488_s0, %s1578_s25  ;;  %s308_s7 = scalar_lea.vmem %s2489_s1, %s1952_s24 }
  0x27   : > { %s1967_s8 = scalar_lea.vmem %s2492_s4, %s1578_s25  ;;  %s1972_s12 = scalar_lea.vmem %s2491_s3, %s1580_s9 }
  0x28   : > { %s1974_s13 = scalar_lea.vmem [#allocation4], %s1576_s14  ;;  %327 = sbr.rel (%p1583_p13) target bundleno = 78 (0x4e), region = 78 }
  0x2d   : > { %vm328_vm0 = vcmask 7168   ;;  %v1856_v4 = vmov -1e+30   ;;  %vm345_vm1 = vcmask 269312   ;;  %v1857_v5 = vmov 0.0  }
  0x2e   : > { %329 = vst.msk [vmem:[#allocation2] sm:$0xff] %vm328_vm0, %v1856_v4 }
  0x2f   : > { %330 = vst.msk [vmem:[#allocation2 + $0x8] sm:$0xff] %vm328_vm0, %v1856_v4 }
  0x30   : > { %331 = vst.msk [vmem:[#allocation2 + $0x10] sm:$0xff] %vm328_vm0, %v1856_v4 }
  0x31   : > { %332 = vst.msk [vmem:[#allocation2 + $0x18] sm:$0xff] %vm328_vm0, %v1856_v4 }
  0x32   : > { %333 = vst.msk [vmem:[#allocation2 + $0x20] sm:$0xff] %vm328_vm0, %v1856_v4 }
  0x33   : > { %334 = vst.msk [vmem:[#allocation2 + $0x28] sm:$0xff] %vm328_vm0, %v1856_v4 }
  0x34   : > { %335 = vst.msk [vmem:[#allocation2 + $0x30] sm:$0xff] %vm328_vm0, %v1856_v4 }
  0x35   : > { %336 = vst.msk [vmem:[#allocation2 + $0x38] sm:$0xff] %vm328_vm0, %v1856_v4 }
  0x36   : > { %337 = vst.msk [vmem:[#allocation2 + $0x40] sm:$0xff] %vm328_vm0, %v1856_v4 }
  0x37   : > { %338 = vst.msk [vmem:[#allocation2 + $0x48] sm:$0xff] %vm328_vm0, %v1856_v4 }
  0x38   : > { %339 = vst.msk [vmem:[#allocation2 + $0x50] sm:$0xff] %vm328_vm0, %v1856_v4 }
  0x39   : > { %340 = vst.msk [vmem:[#allocation2 + $0x58] sm:$0xff] %vm328_vm0, %v1856_v4 }
  0x3a   : > { %341 = vst.msk [vmem:[#allocation2 + $0x60] sm:$0xff] %vm328_vm0, %v1856_v4 }
  0x3b   : > { %342 = vst.msk [vmem:[#allocation2 + $0x68] sm:$0xff] %vm328_vm0, %v1856_v4 }
  0x3c   : > { %343 = vst.msk [vmem:[#allocation2 + $0x70] sm:$0xff] %vm328_vm0, %v1856_v4 }
  0x3d   : > { %344 = vst.msk [vmem:[#allocation2 + $0x78] sm:$0xff] %vm328_vm0, %v1856_v4 }
  0x3e   : > { %346 = vst.msk [vmem:[#allocation3] sm:$0xff] %vm345_vm1, %v1857_v5 }
  0x3f   : > { %347 = vst.msk [vmem:[#allocation3 + $0x8] sm:$0xff] %vm345_vm1, %v1857_v5 }
  0x40   : > { %348 = vst.msk [vmem:[#allocation3 + $0x10] sm:$0xff] %vm345_vm1, %v1857_v5 }
  0x41   : > { %349 = vst.msk [vmem:[#allocation3 + $0x18] sm:$0xff] %vm345_vm1, %v1857_v5 }
  0x42   : > { %350 = vst.msk [vmem:[#allocation3 + $0x20] sm:$0xff] %vm345_vm1, %v1857_v5 }
  0x43   : > { %351 = vst.msk [vmem:[#allocation3 + $0x28] sm:$0xff] %vm345_vm1, %v1857_v5 }
  0x44   : > { %352 = vst.msk [vmem:[#allocation3 + $0x30] sm:$0xff] %vm345_vm1, %v1857_v5 }
  0x45   : > { %353 = vst.msk [vmem:[#allocation3 + $0x38] sm:$0xff] %vm345_vm1, %v1857_v5 }
  0x46   : > { %354 = vst.msk [vmem:[#allocation3 + $0x40] sm:$0xff] %vm345_vm1, %v1857_v5 }
  0x47   : > { %355 = vst.msk [vmem:[#allocation3 + $0x48] sm:$0xff] %vm345_vm1, %v1857_v5 }
  0x48   : > { %356 = vst.msk [vmem:[#allocation3 + $0x50] sm:$0xff] %vm345_vm1, %v1857_v5 }
  0x49   : > { %357 = vst.msk [vmem:[#allocation3 + $0x58] sm:$0xff] %vm345_vm1, %v1857_v5 }
  0x4a   : > { %358 = vst.msk [vmem:[#allocation3 + $0x60] sm:$0xff] %vm345_vm1, %v1857_v5 }
  0x4b   : > { %359 = vst.msk [vmem:[#allocation3 + $0x68] sm:$0xff] %vm345_vm1, %v1857_v5 }
  0x4c   : > { %360 = vst.msk [vmem:[#allocation3 + $0x70] sm:$0xff] %vm345_vm1, %v1857_v5 }
  0x4d   : > { %361 = vst.msk [vmem:[#allocation3 + $0x78] sm:$0xff] %vm345_vm1, %v1857_v5 }
  0x4e PF: > { %v366_v6 = vld [vmem:[%s1958_s30 + $0x20] sm:$0xff]  ;;  %v364_v7 = vld [vmem:[%s1958_s30 + $0x10] sm:$0xff]  ;;  %v1858_v9 = vmov 0   ;;  %v367_v10 = vld [vmem:[%s1958_s30 + $0x28] sm:$0xff]  ;;  %p1584_p0 = scmp.ne.s32.totalorder %s1838_s17, 1 }
  0x4f   : > { %v362_v8 = vld [vmem:[%s1958_s30] sm:$0xff]  ;;  %1699 = vset.pattern.permute.xlu2 %v1858_v9  ;;  %1698 = vset.pattern.permute.xlu1 %v1858_v9  ;;  %v365_v11 = vld [vmem:[%s1958_s30 + $0x18] sm:$0xff]  ;;  %v363_v12 = vld [vmem:[%s1958_s30 + $0x8] sm:$0xff]  ;;  %s1859_s17 = smov (!%p1584_p0), 96  }
  0x50   : > { %1697 = vset.pattern.permute.xlu0 %v1858_v9  ;;  %401 = vperm.xlu2 %1699, %v366_v6   ;;  %v370_v13 = vld [vmem:[%s1958_s30 + $0x40] sm:$0xff]  ;;  %v369_v14 = vld [vmem:[%s1958_s30 + $0x38] sm:$0xff]  ;;  %v368_v15 = vld [vmem:[%s1958_s30 + $0x30] sm:$0xff] }
  0x51   : > { %391 = vperm.xlu1 %1698, %v364_v7   ;;  %381 = vperm.xlu0 %1697, %v362_v8   ;;  %v372_v16 = vld [vmem:[%s1958_s30 + $0x50] sm:$0xff]  ;;  %v374_v17 = vld [vmem:[%s1958_s30 + $0x60] sm:$0xff]  ;;  %v371_v18 = vld [vmem:[%s1958_s30 + $0x48] sm:$0xff] }
  0x52   : > { %v373_v19 = vld [vmem:[%s1958_s30 + $0x58] sm:$0xff]  ;;  %v376_v20 = vld [vmem:[%s1958_s30 + $0x70] sm:$0xff]  ;;  %v375_v21 = vld [vmem:[%s1958_s30 + $0x68] sm:$0xff] }
  0x53   : > { %v377_v22 = vld [vmem:[%s1958_s30 + $0x78] sm:$0xff]  ;;  %v512_v23 = vld [vmem:[%s1974_s13 + $0x10] sm:$0xff]  ;;  %v511_v25 = vld [vmem:[%s1974_s13 + $0x8] sm:$0xff] }
  0x54   : > { %vm516_vm2 = vnez %v512_v23  ;;  %v510_v27 = vld [vmem:[%s1974_s13] sm:$0xff]  ;;  %vm515_vm3 = vnez %v511_v25  ;;  %v513_v50 = vld [vmem:[%s1974_s13 + $0x18] sm:$0xff] }
  0x55   : > { %v2030_v24 = vsel %vm516_vm2, 16843009, %v1858_v9  ;;  %vm514_vm4 = vnez %v510_v27  ;;  %v2036_v30 = vsel %vm515_vm3, 16843009, %v1858_v9  ;;  %v2050_v38 = vld [vmem:[%s308_s7] ss:$0 sm:$0xff]  ;;  %vm517_vm9 = vnez %v513_v50 }
  0x56   : > { %v530_v26 = vunpack.c.0.s8 %v2030_v24  ;;  %v2039_v31 = vsel %vm514_vm4, 16843009, %v1858_v9  ;;  %v526_v33 = vunpack.c.0.s8 %v2036_v30  ;;  %v2065_v60 = vsel %vm517_vm9, 16843009, %v1858_v9 }
  0x57   : > { %v522_v34 = vunpack.c.0.s8 %v2039_v31  ;;  %v534_v63 = vunpack.c.0.s8 %v2065_v60  ;;  %v531_v0 = vunpack.c.1.s8 %v2030_v24  ;;  %v527_v4 = vunpack.c.1.s8 %v2036_v30 }
  0x58   : > { %406 = vperm.xlu2 %1699, %v367_v10   ;;  %v554_v29 = vpack.c.b16 %v530_v26, %v530_v26  ;;  %v546_v36 = vpack.c.b16 %v526_v33, %v526_v33  ;;  %v536_v27 = vunpack.c.2.s8 %v2065_v60 }
  0x59   : > { %396 = vperm.xlu1 %1698, %v365_v11   ;;  %386 = vperm.xlu0 %1697, %v363_v12   ;;  %v538_v37 = vpack.c.b16 %v522_v34, %v522_v34  ;;  %v562_v5 = vpack.c.b16 %v534_v63, %v534_v63  ;;  %v556_v6 = vpack.c.b16 %v531_v0, %v531_v0  ;;  %v523_v11 = vunpack.c.1.s8 %v2039_v31 }
  0x5a   : > { %v555_v32 = vpack.c.b8 %v554_v29, %v554_v29  ;;  %v547_v40 = vpack.c.b8 %v546_v36, %v546_v36  ;;  %v548_v7 = vpack.c.b16 %v527_v4, %v527_v4  ;;  %v535_v12 = vunpack.c.1.s8 %v2065_v60 }
  0x5b   : > { %v539_v41 = vpack.c.b8 %v538_v37, %v538_v37  ;;  %v563_v8 = vpack.c.b8 %v562_v5, %v562_v5  ;;  %v557_v10 = vpack.c.b8 %v556_v6, %v556_v6  ;;  %v528_v63 = vunpack.c.2.s8 %v2036_v30 }
  0x5c   : > { %vm578_vm5 = vnez %v555_v32  ;;  %vm574_vm6 = vnez %v547_v40 }
  0x5d   : > { %v594_v39 = vsel %vm578_vm5, 16843009, %v1858_v9  ;;  %vm570_vm7 = vnez %v539_v41  ;;  %v590_v48 = vsel %vm574_vm6, 16843009, %v1858_v9  ;;  %vm582_vm12 = vnez %v563_v8 }
  0x5e   : > { %v610_v43 = vunpack.c.0.s8 %v594_v39  ;;  %v586_v49 = vsel %vm570_vm7, 16843009, %v1858_v9  ;;  %v606_v53 = vunpack.c.0.s8 %v590_v48  ;;  %vm579_vm13 = vnez %v557_v10 }
  0x5f   : > { %v602_v56 = vunpack.c.0.s8 %v586_v49  ;;  %v533_v48 = vunpack.c.3.s8 %v2030_v24 }
  0x60   : > { %421 = vperm.xlu2 %1699, %v370_v13   ;;  %vm626_vm8 = vcmp.ne.s32.totalorder %v610_v43, 0  ;;  %vm622_vm10 = vcmp.ne.s32.totalorder %v606_v53, 0 }
  0x61   : > { %416 = vperm.xlu1 %1698, %v369_v14   ;;  %411 = vperm.xlu0 %1697, %v368_v15   ;;  %vm618_vm11 = vcmp.ne.s32.totalorder %v602_v56, 0  ;;  %v524_v15 = vunpack.c.2.s8 %v2039_v31  ;;  %v560_v8 = vpack.c.b16 %v533_v48, %v533_v48 }
  0x68   : > { %431 = vperm.xlu2 %1699, %v372_v16   ;;  %v549_v16 = vpack.c.b8 %v548_v7, %v548_v7 }
  0x69   : > { %441 = vperm.xlu1 %1698, %v374_v17   ;;  %426 = vperm.xlu0 %1697, %v371_v18   ;;  %v532_v17 = vunpack.c.2.s8 %v2030_v24  ;;  %v540_v18 = vpack.c.b16 %v523_v11, %v523_v11 }
  0x6a   : > { %vm575_vm14 = vnez %v549_v16 }
  0x6b   : > { %v558_v23 = vpack.c.b16 %v532_v17, %v532_v17  ;;  %v541_v25 = vpack.c.b8 %v540_v18, %v540_v18  ;;  %v591_v34 = vsel %vm575_vm14, 16843009, %v1858_v9  ;;  %v550_v18 = vpack.c.b16 %v528_v63, %v528_v63 }
  0x6d   : > { %v559_v40 = vpack.c.b8 %v558_v23, %v558_v23  ;;  %vm571_vm15 = vnez %v541_v25  ;;  %v561_v25 = vpack.c.b8 %v560_v8, %v560_v8 }
  0x6f   : > { %vm580_vm4 = vnez %v559_v40 }
  0x70   : > { %436 = vperm.xlu2 %1699, %v373_v19   ;;  %v564_v19 = vpack.c.b16 %v535_v12, %v535_v12  ;;  %v596_v7 = vsel %vm580_vm4, 16843009, %v1858_v9 }
  0x71   : > { %451 = vperm.xlu1 %1698, %v376_v20   ;;  %446 = vperm.xlu0 %1697, %v375_v21   ;;  %v542_v20 = vpack.c.b16 %v524_v15, %v524_v15  ;;  %v598_v21 = vsel %vm582_vm12, 16843009, %v1858_v9 }
  0x72   : > { %v565_v26 = vpack.c.b8 %v564_v19, %v564_v19  ;;  %v614_v32 = vunpack.c.0.s8 %v598_v21 }
  0x73   : > { %v543_v36 = vpack.c.b8 %v542_v20, %v542_v20  ;;  %v525_v20 = vunpack.c.3.s8 %v2039_v31 }
  0x74   : > { %vm583_vm0 = vnez %v565_v26  ;;  %vm630_vm1 = vcmp.ne.s32.totalorder %v614_v32, 0 }
  0x75   : > { %vm2095_vm3 = vnez %v543_v36 }
  0x76   : > { %v588_v6 = vsel %vm2095_vm3, 16843009, %v1858_v9 }
  0x77   : > { %v604_v23 = vunpack.c.0.s8 %v588_v6 }
  0x79   : > { %456 = vperm.xlu0 %1697, %v377_v22   ;;  %v595_v22 = vsel %vm579_vm13, 16843009, %v1858_v9  ;;  %vm2137_vm9 = vcmp.ne.s32.totalorder %v604_v23, 0 }
  0x7a   : > { %v611_v33 = vunpack.c.0.s8 %v595_v22 }
  0x7c   : > { %vm627_vm2 = vcmp.ne.s32.totalorder %v611_v33, 0 }
  0xaa   : > { %v402_v28 = vpop.permute.xlu2 %401 }
  0xab   : > { %v466_v45 = vadd.f32 %v2050_v38, %v402_v28 }
  0xad   : > { %v482_v51 = vmul.f32 0.2, %v466_v45 }
  0xaf   : > { %v498_v58 = vmax.f32 %v466_v45, %v482_v51  ;;  %v599_v51 = vsel %vm583_vm0, 16843009, %v1858_v9 }
  0xb0   : > { %v615_v5 = vunpack.c.0.s8 %v599_v51 }
  0xb1   : > { %v2067_v62 = vsel %vm622_vm10, %v498_v58, -1e+30  ;;  %vm581_vm10 = vnez %v561_v25  ;;  %v2190_v25 = vld [vmem:[#allocation2 + $0x20] sm:$0xff] }
  0xb2   : > { %v2043_v35 = vpop.permute.xlu2 %406 }
  0xb3   : > { %v467_v41 = vadd.f32 %v2050_v38, %v2043_v35  ;;  %v587_v35 = vsel %vm571_vm15, 16843009, %v1858_v9 }
  0xb5   : > { %v483_v53 = vmul.f32 0.2, %v467_v41 }
  0xb7   : > { %v499_v11 = vmax.f32 %v467_v41, %v483_v53  ;;  %v544_v41 = vpack.c.b16 %v525_v20, %v525_v20  ;;  %v2180_v20 = vld [vmem:[#allocation2 + $0x40] sm:$0xff] }
  0xba   : > { %v422_v42 = vpop.permute.xlu2 %421 }
  0xbb   : > { %v470_v44 = vadd.f32 %v2050_v38, %v422_v42  ;;  %v566_v42 = vpack.c.b16 %v536_v27, %v536_v27 }
  0xbd   : > { %v486_v46 = vmul.f32 0.2, %v470_v44  ;;  %v567_v56 = vpack.c.b8 %v566_v42, %v566_v42 }
  0xbf   : > { %v502_v47 = vmax.f32 %v470_v44, %v486_v46  ;;  %v607_v46 = vunpack.c.0.s8 %v591_v34  ;;  %vm584_vm6 = vnez %v567_v56  ;;  %v551_v34 = vpack.c.b8 %v550_v18, %v550_v18 }
  0xc0   : > { %v600_v22 = vsel %vm584_vm6, 16843009, %v1858_v9  ;;  %vm1116_vm6 = vcmask 7168  }
  0xc1   : > { %v2058_v52 = vsel %vm626_vm8, %v502_v47, -1e+30  ;;  %vm2110_vm5 = vcmp.ne.s32.totalorder %v607_v46, 0  ;;  %vm631_vm8 = vcmp.ne.s32.totalorder %v615_v5, 0  ;;  %vm576_vm12 = vnez %v551_v34 }
  0xc2   : > { %682 = vmax.xlane.f32.xlu2 %v2058_v52  ;;  %v2127_v26 = vsel %vm2110_vm5, %v499_v11, -1e+30  ;;  %v592_v51 = vsel %vm576_vm12, 16843009, %v1858_v9 }
  0xc3   : > { %v2061_v54 = vpop.permute.xlu1 %391  ;;  %v382_v55 = vpop.permute.xlu0 %381 }
  0xc4   : > { %v462_v57 = vadd.f32 %v2050_v38, %v382_v55  ;;  %v432_v55 = vpop.permute.xlu2 %431  ;;  %v464_v10 = vadd.f32 %v2050_v38, %v2061_v54 }
  0xc5   : > { %v472_v19 = vadd.f32 %v2050_v38, %v432_v55 }
  0xc6   : > { %v478_v59 = vmul.f32 0.2, %v462_v57  ;;  %v480_v54 = vmul.f32 0.2, %v464_v10 }
  0xc7   : > { %v488_v31 = vmul.f32 0.2, %v472_v19 }
  0xc8   : > { %v494_v61 = vmax.f32 %v462_v57, %v478_v59  ;;  %v537_v57 = vunpack.c.3.s8 %v2065_v60  ;;  %v496_v42 = vmax.f32 %v464_v10, %v480_v54  ;;  %v650_v54 = vld [vmem:[#allocation2] sm:$0xff] }
  0xc9   : > { %v504_v48 = vmax.f32 %v472_v19, %v488_v31 }
  0xca   : > { %674 = vmax.xlane.f32.xlu2 %v2067_v62  ;;  %v2072_v1 = vsel %vm618_vm11, %v494_v61, -1e+30  ;;  %v568_v12 = vpack.c.b16 %v537_v57, %v537_v57 }
  0xcb   : > { %v2074_v2 = vpop.permute.xlu1 %396  ;;  %666 = vmax.xlane.f32.xlu1 %v2072_v1  ;;  %v387_v3 = vpop.permute.xlu0 %386 }
  0xcc   : > { %v463_v43 = vadd.f32 %v2050_v38, %v387_v3  ;;  %v603_v3 = vunpack.c.0.s8 %v587_v35  ;;  %v569_v27 = vpack.c.b8 %v568_v12, %v568_v12  ;;  %v437_v36 = vpop.permute.xlu2 %436  ;;  %v2149_v35 = vsel %vm2137_vm9, %v496_v42, -1e+30  ;;  %v2217_v42 = vld [vmem:[#allocation2 + $0x28] sm:$0xff] }
  0xcd   : > { %v465_v6 = vadd.f32 %v2050_v38, %v2074_v2 }
  0xce   : > { %v479_v58 = vmul.f32 0.2, %v463_v43  ;;  %vm619_vm7 = vcmp.ne.s32.totalorder %v603_v3, 0  ;;  %vm585_vm11 = vnez %v569_v27  ;;  %v608_v3 = vunpack.c.0.s8 %v592_v51  ;;  %v652_v51 = vld [vmem:[#allocation2 + $0x10] sm:$0xff] }
  0xd0   : > { %v495_v17 = vmax.f32 %v463_v43, %v479_v58  ;;  %v545_v58 = vpack.c.b8 %v544_v41, %v544_v41  ;;  %vm624_vm3 = vcmp.ne.s32.totalorder %v608_v3, 0 }
  0xd2   : > { %v2130_v32 = vsel %vm619_vm7, %v495_v17, -1e+30  ;;  %vm573_vm0 = vnez %v545_v58  ;;  %vm1099_vm7 = vcmask 269312  }
  0xd3   : > { %v2080_v13 = vpop.permute.xlu1 %416  ;;  %v2082_v14 = vpop.permute.xlu0 %411  ;;  %v589_v10 = vsel %vm573_vm0, 16843009, %v1858_v9 }
  0xd4   : > { %v468_v47 = vadd.f32 %v2050_v38, %v2082_v14  ;;  %v469_v4 = vadd.f32 %v2050_v38, %v2080_v13  ;;  %v481_v13 = vmul.f32 0.2, %v465_v6  ;;  %v605_v2 = vunpack.c.0.s8 %v589_v10 }
  0xd6   : > { %v484_v14 = vmul.f32 0.2, %v468_v47  ;;  %v485_v11 = vmul.f32 0.2, %v469_v4  ;;  %v497_v18 = vmax.f32 %v465_v6, %v481_v13  ;;  %vm621_vm5 = vcmp.ne.s32.totalorder %v605_v2, 0  ;;  %v2255_v6 = vld [vmem:[#allocation2 + $0x30] sm:$0xff] }
  0xd8   : > { %v501_v17 = vmax.f32 %v469_v4, %v485_v11  ;;  %v2177_v19 = vsel %vm621_vm5, %v497_v18, -1e+30 }
  0xdb   : > { %v442_v28 = vpop.permute.xlu1 %441  ;;  %v427_v29 = vpop.permute.xlu0 %426 }
  0xdc   : > { %v474_v37 = vadd.f32 %v2050_v38, %v442_v28  ;;  %v471_v39 = vadd.f32 %v2050_v38, %v427_v29  ;;  %v529_v28 = vunpack.c.3.s8 %v2036_v30  ;;  %v612_v30 = vunpack.c.0.s8 %v596_v7 }
  0xdd   : > { %v500_v7 = vmax.f32 %v468_v47, %v484_v14 }
  0xde   : > { %v490_v44 = vmul.f32 0.2, %v474_v37  ;;  %v487_v45 = vmul.f32 0.2, %v471_v39  ;;  %v552_v43 = vpack.c.b16 %v529_v28, %v529_v28  ;;  %vm628_vm14 = vcmp.ne.s32.totalorder %v612_v30, 0 }
  0xdf   : > { %v2156_v63 = vsel %vm628_vm14, %v504_v48, -1e+30 }
  0xe0   : > { %v506_v49 = vmax.f32 %v474_v37, %v490_v44  ;;  %v503_v50 = vmax.f32 %v471_v39, %v487_v45  ;;  %v616_v39 = vunpack.c.0.s8 %v600_v22  ;;  %v473_v44 = vadd.f32 %v2050_v38, %v437_v36  ;;  %v2201_v36 = vld [vmem:[#allocation2 + $0x48] sm:$0xff] }
  0xe1   : > { %v553_v53 = vpack.c.b8 %v552_v43, %v552_v43  ;;  %v651_v43 = vld [vmem:[#allocation2 + $0x8] sm:$0xff] }
  0xe2   : > { %v2103_v59 = vsel %vm630_vm1, %v506_v49, -1e+30  ;;  %v2105_v61 = vsel %vm627_vm2, %v503_v50, -1e+30  ;;  %vm632_vm13 = vcmp.ne.s32.totalorder %v616_v39, 0 }
  0xe3   : > { %v452_v24 = vpop.permute.xlu1 %451  ;;  %690 = vmax.xlane.f32.xlu0 %v2103_v59  ;;  %684 = vmax.xlane.f32.xlu1 %v2105_v61  ;;  %v447_v0 = vpop.permute.xlu0 %446  ;;  %v597_v49 = vsel %vm581_vm10, 16843009, %v1858_v9  ;;  %v601_v50 = vsel %vm585_vm11, 16843009, %v1858_v9  ;;  %v489_v55 = vmul.f32 0.2, %v473_v44  ;;  %vm577_vm15 = vnez %v553_v53 }
  0xe4   : > { %v475_v60 = vadd.f32 %v2050_v38, %v447_v0  ;;  %v476_v15 = vadd.f32 %v2050_v38, %v452_v24  ;;  %v613_v24 = vunpack.c.0.s8 %v597_v49  ;;  %v617_v0 = vunpack.c.0.s8 %v601_v50  ;;  %v2234_v53 = vld [vmem:[#allocation2 + $0x70] sm:$0xff] }
  0xe5   : > { %v505_v5 = vmax.f32 %v473_v44, %v489_v55  ;;  %v593_v8 = vsel %vm577_vm15, 16843009, %v1858_v9  ;;  %v2219_v44 = vld [vmem:[#allocation2 + $0x68] sm:$0xff]  ;;  %v2236_v55 = vld [vmem:[#allocation2 + $0x50] sm:$0xff] }
  0xe6   : > { %v491_v16 = vmul.f32 0.2, %v475_v60  ;;  %v492_v29 = vmul.f32 0.2, %v476_v15  ;;  %vm629_vm1 = vcmp.ne.s32.totalorder %v613_v24, 0  ;;  %vm633_vm2 = vcmp.ne.s32.totalorder %v617_v0, 0 }
  0xe7   : > { %v2165_v12 = vsel %vm629_vm1, %v505_v5, -1e+30  ;;  %v2251_v5 = vld [vmem:[#allocation2 + $0x78] sm:$0xff] }
  0xe8   : > { %v507_v21 = vmax.f32 %v475_v60, %v491_v16  ;;  %v508_v46 = vmax.f32 %v476_v15, %v492_v29  ;;  %v2170_v16 = vsel %vm624_vm3, %v500_v7, -1e+30 }
  0xea   : > { %v2132_v33 = vsel %vm631_vm8, %v507_v21, -1e+30  ;;  %v2152_v57 = vsel %vm632_vm13, %v508_v46, -1e+30 }
  0xeb   : > { %668 = vmax.xlane.f32.xlu0 %v2130_v32  ;;  %676 = vmax.xlane.f32.xlu1 %v2127_v26  ;;  %v457_v37 = vpop.permute.xlu0 %456 }
  0xec   : > { %692 = vmax.xlane.f32.xlu2 %v2132_v33  ;;  %v477_v45 = vadd.f32 %v2050_v38, %v457_v37  ;;  %v609_v38 = vunpack.c.0.s8 %v593_v8  ;;  %v2203_v37 = vld [vmem:[#allocation2 + $0x60] sm:$0xff] }
  0xee   : > { %v493_v56 = vmul.f32 0.2, %v477_v45  ;;  %vm625_vm4 = vcmp.ne.s32.totalorder %v609_v38, 0 }
  0xef   : > { %v2174_v9 = vsel %vm625_vm4, %v501_v17, -1e+30 }
  0xf0   : > { %v509_v60 = vmax.f32 %v477_v45, %v493_v56 }
  0xf2   : > { %v2167_v15 = vsel %vm633_vm2, %v509_v60, -1e+30  ;;  %v2253_v60 = vld [vmem:[#allocation2 + $0x58] sm:$0xff] }
  0xf3   : > { %694 = vmax.xlane.f32.xlu0 %v2152_v57  ;;  %670 = vmax.xlane.f32.xlu1 %v2149_v35 }
  0xf4   : > { %686 = vmax.xlane.f32.xlu2 %v2156_v63 }
  0xfb   : > { %688 = vmax.xlane.f32.xlu0 %v2165_v12  ;;  %696 = vmax.xlane.f32.xlu1 %v2167_v15 }
  0xfc   : > { %678 = vmax.xlane.f32.xlu2 %v2170_v16 }
 0x103   : > { %680 = vmax.xlane.f32.xlu0 %v2174_v9 }
 0x104   : > { %672 = vmax.xlane.f32.xlu2 %v2177_v19 }
 0x135   : > { %v683_v21 = vpop.xlane.xlu2 %682 }
 0x136   : > { %v2183_v22 = vmax.f32 %v2180_v20, %v683_v21  ;;  %v2271_v21 = vld [vmem:[#allocation2 + $0x38] sm:$0xff] }
 0x138   : > { %v722_v23 = vsub.f32 %v2180_v20, %v2183_v22  ;;  %1125 = vst.msk [vmem:[#allocation2 + $0x40] sm:$0xff] %vm1116_vm6, %v2183_v22  ;;  %804 = vperm.xlu1 %1698, %v2183_v22  }
 0x13d   : > { %v675_v27 = vpop.xlane.xlu2 %674 }
 0x13e   : > { %v2193_v28 = vmax.f32 %v2190_v25, %v675_v27  ;;  %v667_v29 = vpop.xlane.xlu1 %666  ;;  %v1017_v27 = vld [vmem:[%s1972_s12 + $0x78] sm:$0xff] }
 0x13f   : > { %v698_v34 = vmax.f32 %v650_v54, %v667_v29  ;;  %1589 = vmatpush.msra.mxu2 %v1017_v27  ;;  %1018 = vmatpush.msra.mxu0 %v1017_v27 }
 0x140   : > { %v718_v31 = vsub.f32 %v2190_v25, %v2193_v28  ;;  %1121 = vst.msk [vmem:[#allocation2 + $0x20] sm:$0xff] %vm1116_vm6, %v2193_v28  ;;  %784 = vperm.xlu1 %1698, %v2193_v28   ;;  %1588 = vmatpush.msra.mxu1 %v1017_v27 }
 0x141   : > { %1117 = vst.msk [vmem:[#allocation2] sm:$0xff] %vm1116_vm6, %v698_v34  ;;  %764 = vperm.xlu0 %1697, %v698_v34   ;;  %v714_v4 = vsub.f32 %v650_v54, %v698_v34  ;;  %v653_v54 = vld [vmem:[#allocation2 + $0x18] sm:$0xff]  ;;  %1590 = vmatpush.msra.mxu3 %v1017_v27  ;;  %v1008_v27 = vld [vmem:[%s1972_s12 + $0x30] sm:$0xff] }
 0x143   : > { %v730_v7 = vmul.f32 1.442695, %v714_v4  ;;  %v738_v4 = vmul.f32 1.442695, %v718_v31  ;;  %v1010_v31 = vld [vmem:[%s1972_s12 + $0x40] sm:$0xff] }
 0x145   : > { %1701 = vpow2.f32 %v730_v7 }
 0x156   : > { %v685_v39 = vpop.xlane.xlu1 %684  ;;  %v691_v40 = vpop.xlane.xlu0 %690 }
 0x157   : > { %v2206_v30 = vmax.f32 %v2201_v36, %v685_v39  ;;  %v2209_v41 = vmax.f32 %v2203_v37, %v691_v40 }
 0x159   : > { %1126 = vst.msk [vmem:[#allocation2 + $0x48] sm:$0xff] %vm1116_vm6, %v2206_v30  ;;  %809 = vperm.xlu0 %1697, %v2206_v30   ;;  %824 = vperm.xlu2 %1699, %v2209_v41  }
 0x15a   : > { %1129 = vst.msk [vmem:[#allocation2 + $0x60] sm:$0xff] %vm1116_vm6, %v2209_v41 }
 0x15e   : > { %v677_v45 = vpop.xlane.xlu1 %676  ;;  %v669_v46 = vpop.xlane.xlu0 %668 }
 0x15f   : > { %v2222_v47 = vmax.f32 %v2217_v42, %v677_v45  ;;  %v693_v48 = vpop.xlane.xlu2 %692  ;;  %v699_v49 = vmax.f32 %v651_v43, %v669_v46 }
 0x160   : > { %v2225_v50 = vmax.f32 %v2219_v44, %v693_v48 }
 0x161   : > { %1122 = vst.msk [vmem:[#allocation2 + $0x28] sm:$0xff] %vm1116_vm6, %v2222_v47  ;;  %789 = vperm.xlu0 %1697, %v2222_v47   ;;  %769 = vperm.xlu1 %1698, %v699_v49   ;;  %v715_v18 = vsub.f32 %v651_v43, %v699_v49  ;;  %v1702_v43 = vpop.eup %1701  ;;  %v719_v48 = vsub.f32 %v2217_v42, %v2222_v47  ;;  %v1013_v47 = vld [vmem:[%s1972_s12 + $0x58] sm:$0xff] }
 0x162   : > { %1130 = vst.msk [vmem:[#allocation2 + $0x68] sm:$0xff] %vm1116_vm6, %v2225_v50  ;;  %829 = vperm.xlu2 %1699, %v2225_v50  }
 0x163   : > { %1118 = vst.msk [vmem:[#allocation2 + $0x8] sm:$0xff] %vm1116_vm6, %v699_v49  ;;  %v732_v39 = vmul.f32 1.442695, %v715_v18  ;;  %v1009_v18 = vld [vmem:[%s1972_s12 + $0x38] sm:$0xff] }
 0x166   : > { %v671_v56 = vpop.xlane.xlu1 %670  ;;  %v695_v58 = vpop.xlane.xlu0 %694 }
 0x167   : > { %v700_v14 = vmax.f32 %v652_v51, %v671_v56  ;;  %v687_v24 = vpop.xlane.xlu2 %686  ;;  %v2239_v0 = vmax.f32 %v2234_v53, %v695_v58  ;;  %v1015_v56 = vld [vmem:[%s1972_s12 + $0x68] sm:$0xff] }
 0x168   : > { %v2242_v3 = vmax.f32 %v2236_v55, %v687_v24  ;;  %v740_v24 = vmul.f32 1.442695, %v719_v48  ;;  %v1003_v48 = vld [vmem:[%s1972_s12 + $0x8] sm:$0xff] }
 0x169   : > { %1119 = vst.msk [vmem:[#allocation2 + $0x10] sm:$0xff] %vm1116_vm6, %v700_v14  ;;  %774 = vperm.xlu0 %1697, %v700_v14   ;;  %834 = vperm.xlu1 %1698, %v2239_v0   ;;  %v716_v17 = vsub.f32 %v652_v51, %v700_v14  ;;  %v1016_v51 = vld [vmem:[%s1972_s12 + $0x70] sm:$0xff]  ;;  %v1014_v14 = vld [vmem:[%s1972_s12 + $0x60] sm:$0xff] }
 0x16a   : > { %1127 = vst.msk [vmem:[#allocation2 + $0x50] sm:$0xff] %vm1116_vm6, %v2242_v3  ;;  %814 = vperm.xlu2 %1699, %v2242_v3   ;;  %1592 = vmatpush.msra.mxu2 %v1016_v51 }
 0x16b   : > { %1131 = vst.msk [vmem:[#allocation2 + $0x70] sm:$0xff] %vm1116_vm6, %v2239_v0  ;;  %v734_v29 = vmul.f32 1.442695, %v716_v17  ;;  %1019 = vmatpush.msra.mxu0 %v1016_v51  ;;  %1591 = vmatpush.msra.mxu1 %v1016_v51  ;;  %v723_v17 = vsub.f32 %v2201_v36, %v2206_v30  ;;  %v1007_v30 = vld [vmem:[%s1972_s12 + $0x28] sm:$0xff] }
 0x16c   : > { %1593 = vmatpush.msra.mxu3 %v1016_v51  ;;  %1595 = vmatpush.msra.mxu2 %v1015_v56  ;;  %v1002_v51 = vld [vmem:[%s1972_s12] sm:$0xff] }
 0x16d   : > { %1703 = vpow2.f32 %v734_v29  ;;  %1020 = vmatpush.msra.mxu0 %v1015_v56  ;;  %1594 = vmatpush.msra.mxu1 %v1015_v56  ;;  %v748_v20 = vmul.f32 1.442695, %v723_v17 }
 0x16e   : > { %v697_v8 = vpop.xlane.xlu1 %696  ;;  %v689_v10 = vpop.xlane.xlu0 %688  ;;  %1705 = vpow2.f32 %v732_v39  ;;  %1596 = vmatpush.msra.mxu3 %v1015_v56  ;;  %1598 = vmatpush.msra.mxu2 %v1014_v14 }
 0x16f   : > { %v679_v11 = vpop.xlane.xlu2 %678  ;;  %v2258_v13 = vmax.f32 %v2251_v5, %v697_v8  ;;  %v2261_v38 = vmax.f32 %v2253_v60, %v689_v10  ;;  %1021 = vmatpush.msra.mxu0 %v1014_v14  ;;  %1597 = vmatpush.msra.mxu1 %v1014_v14  ;;  %v1012_v10 = vld [vmem:[%s1972_s12 + $0x50] sm:$0xff] }
 0x170   : > { %v704_v2 = vmax.f32 %v2255_v6, %v679_v11  ;;  %1599 = vmatpush.msra.mxu3 %v1014_v14  ;;  %1601 = vmatpush.msra.mxu2 %v1013_v47  ;;  %v1011_v11 = vld [vmem:[%s1972_s12 + $0x48] sm:$0xff] }
 0x171   : > { %1132 = vst.msk [vmem:[#allocation2 + $0x78] sm:$0xff] %vm1116_vm6, %v2258_v13  ;;  %839 = vperm.xlu0 %1697, %v2258_v13   ;;  %819 = vperm.xlu1 %1698, %v2261_v38   ;;  %v725_v22 = vsub.f32 %v2253_v60, %v2261_v38  ;;  %v726_v60 = vsub.f32 %v2203_v37, %v2209_v41 }
 0x172   : > { %1123 = vst.msk [vmem:[#allocation2 + $0x30] sm:$0xff] %vm1116_vm6, %v704_v2  ;;  %794 = vperm.xlu2 %1699, %v704_v2   ;;  %v720_v42 = vsub.f32 %v2255_v6, %v704_v2  ;;  %1022 = vmatpush.msra.mxu0 %v1013_v47  ;;  %v746_v2 = vmul.f32 1.442695, %v722_v23  ;;  %v724_v23 = vsub.f32 %v2236_v55, %v2242_v3  ;;  %v1006_v3 = vld [vmem:[%s1972_s12 + $0x20] sm:$0xff] }
 0x173   : > { %1128 = vst.msk [vmem:[#allocation2 + $0x58] sm:$0xff] %vm1116_vm6, %v2261_v38  ;;  %v1704_v7 = vpop.eup %1703  ;;  %1604 = vmatpush.msra.mxu2 %v1012_v10  ;;  %1600 = vmatpush.msra.mxu1 %v1013_v47  ;;  %v752_v38 = vmul.f32 1.442695, %v725_v22  ;;  %v728_v37 = vsub.f32 %v2234_v53, %v2239_v0  ;;  %v727_v41 = vsub.f32 %v2219_v44, %v2225_v50 }
 0x174   : > { %v1706_v8 = vpop.eup %1705  ;;  %v742_v6 = vmul.f32 1.442695, %v720_v42  ;;  %1602 = vmatpush.msra.mxu3 %v1013_v47  ;;  %1023 = vmatpush.msra.mxu0 %v1012_v10  ;;  %v750_v55 = vmul.f32 1.442695, %v724_v23  ;;  %v729_v53 = vsub.f32 %v2251_v5, %v2258_v13 }
 0x175   : > { %1607 = vmatpush.msra.mxu2 %v1011_v11  ;;  %1603 = vmatpush.msra.mxu1 %v1012_v10  ;;  %v756_v0 = vmul.f32 1.442695, %v727_v41 }
 0x176   : > { %v681_v34 = vpop.xlane.xlu0 %680  ;;  %1605 = vmatpush.msra.mxu3 %v1012_v10  ;;  %1024 = vmatpush.msra.mxu0 %v1011_v11  ;;  %v760_v56 = vmul.f32 1.442695, %v729_v53 }
 0x177   : > { %v673_v40 = vpop.xlane.xlu2 %672  ;;  %v705_v45 = vmax.f32 %v2271_v21, %v681_v34  ;;  %1610 = vmatpush.msra.mxu2 %v1010_v31  ;;  %1606 = vmatpush.msra.mxu1 %v1011_v11  ;;  %v1005_v34 = vld [vmem:[%s1972_s12 + $0x18] sm:$0xff] }
 0x178   : > { %v701_v46 = vmax.f32 %v653_v54, %v673_v40  ;;  %1608 = vmatpush.msra.mxu3 %v1011_v11  ;;  %1025 = vmatpush.msra.mxu0 %v1010_v31 }
 0x179   : > { %1124 = vst.msk [vmem:[#allocation2 + $0x38] sm:$0xff] %vm1116_vm6, %v705_v45  ;;  %908 = vperm.xlu0 %1697, %v1702_v43   ;;  %799 = vperm.xlu1 %1698, %v705_v45   ;;  %v721_v25 = vsub.f32 %v2271_v21, %v705_v45  ;;  %v1004_v45 = vld [vmem:[%s1972_s12 + $0x10] sm:$0xff]  ;;  %v754_v43 = vmul.f32 1.442695, %v726_v60 }
 0x17a   : > { %v717_v49 = vsub.f32 %v653_v54, %v701_v46  ;;  %1120 = vst.msk [vmem:[#allocation2 + $0x18] sm:$0xff] %vm1116_vm6, %v701_v46  ;;  %779 = vperm.xlu2 %1699, %v701_v46   ;;  %1613 = vmatpush.msra.mxu2 %v1009_v18 }
 0x17b   : > { %v744_v21 = vmul.f32 1.442695, %v721_v25  ;;  %1609 = vmatpush.msra.mxu1 %v1010_v31  ;;  %1611 = vmatpush.msra.mxu3 %v1010_v31 }
 0x17c   : > { %v736_v58 = vmul.f32 1.442695, %v717_v49  ;;  %1616 = vmatpush.msra.mxu2 %v1008_v27  ;;  %1026 = vmatpush.msra.mxu0 %v1009_v18  ;;  %v758_v49 = vmul.f32 1.442695, %v728_v37 }
 0x17d   : > { %1612 = vmatpush.msra.mxu1 %v1009_v18  ;;  %1614 = vmatpush.msra.mxu3 %v1009_v18 }
 0x17e   : > { %1707 = vpow2.f32 %v736_v58  ;;  %1619 = vmatpush.msra.mxu2 %v1007_v30  ;;  %1027 = vmatpush.msra.mxu0 %v1008_v27 }
 0x17f   : > { %1709 = vpow2.f32 %v740_v24  ;;  %1615 = vmatpush.msra.mxu1 %v1008_v27  ;;  %1617 = vmatpush.msra.mxu3 %v1008_v27 }
 0x180   : > { %1711 = vpow2.f32 %v738_v4  ;;  %1622 = vmatpush.msra.mxu2 %v1006_v3  ;;  %1028 = vmatpush.msra.mxu0 %v1007_v30 }
 0x181   : > { %918 = vperm.xlu1 %1698, %v1704_v7   ;;  %1713 = vpow2.f32 %v742_v6  ;;  %1618 = vmatpush.msra.mxu1 %v1007_v30 }
 0x182   : > { %913 = vperm.xlu2 %1699, %v1706_v8   ;;  %1715 = vpow2.f32 %v746_v2  ;;  %1625 = vmatpush.msra.mxu2 %v1005_v34 }
 0x183   : > { %1717 = vpow2.f32 %v744_v21  ;;  %1620 = vmatpush.msra.mxu3 %v1007_v30  ;;  %1029 = vmatpush.msra.mxu0 %v1006_v3 }
 0x184   : > { %v1708_v28 = vpop.eup %1707  ;;  %1719 = vpow2.f32 %v748_v20  ;;  %1628 = vmatpush.msra.mxu2 %v1004_v45  ;;  %1621 = vmatpush.msra.mxu1 %v1006_v3 }
 0x185   : > { %923 = vperm.xlu0 %1697, %v1708_v28   ;;  %v1710_v54 = vpop.eup %1709  ;;  %1721 = vpow2.f32 %v752_v38  ;;  %1623 = vmatpush.msra.mxu3 %v1006_v3 }
 0x186   : > { %v1712_v29 = vpop.eup %1711  ;;  %1723 = vpow2.f32 %v750_v55  ;;  %1631 = vmatpush.msra.mxu2 %v1003_v48  ;;  %1030 = vmatpush.msra.mxu0 %v1005_v34 }
 0x187   : > { %v1714_v36 = vpop.eup %1713  ;;  %1725 = vpow2.f32 %v754_v43  ;;  %1624 = vmatpush.msra.mxu1 %v1005_v34  ;;  %1626 = vmatpush.msra.mxu3 %v1005_v34 }
 0x188   : > { %v1716_v39 = vpop.eup %1715  ;;  %1634 = vmatpush.msra.mxu2 %v1002_v51  ;;  %1031 = vmatpush.msra.mxu0 %v1004_v45  ;;  %1727 = vpow2.f32 %v758_v49 }
 0x189   : > { %933 = vperm.xlu1 %1698, %v1710_v54   ;;  %v1718_v40 = vpop.eup %1717  ;;  %1627 = vmatpush.msra.mxu1 %v1004_v45  ;;  %1729 = vpow2.f32 %v756_v0 }
 0x18a   : > { %928 = vperm.xlu2 %1699, %v1712_v29   ;;  %v1720_v46 = vpop.eup %1719  ;;  %1629 = vmatpush.msra.mxu3 %v1004_v45  ;;  %1731 = vpow2.f32 %v760_v56 }
 0x18b   : > { %v1722_v44 = vpop.eup %1721  ;;  %1032 = vmatpush.msra.mxu0 %v1003_v48  ;;  %1630 = vmatpush.msra.mxu1 %v1003_v48 }
 0x18c   : > { %v1724_v50 = vpop.eup %1723  ;;  %1632 = vmatpush.msra.mxu3 %v1003_v48 }
 0x18d   : > { %938 = vperm.xlu0 %1697, %v1714_v36   ;;  %v1726_v5 = vpop.eup %1725  ;;  %1033 = vmatpush.msra.mxu0 %v1002_v51 }
 0x18e   : > { %1633 = vmatpush.msra.mxu1 %v1002_v51  ;;  %1635 = vmatpush.msra.mxu3 %v1002_v51  ;;  %v1728_v13 = vpop.eup %1727 }
 0x18f   : > { %v1730_v58 = vpop.eup %1729 }
 0x190   : > { %v1732_v14 = vpop.eup %1731 }
 0x191   : > { %948 = vperm.xlu1 %1698, %v1716_v39  }
 0x192   : > { %943 = vperm.xlu2 %1699, %v1718_v40  }
 0x195   : > { %953 = vperm.xlu0 %1697, %v1720_v46  }
 0x199   : > { %963 = vperm.xlu1 %1698, %v1722_v44  }
 0x19a   : > { %958 = vperm.xlu2 %1699, %v1724_v50  }
 0x19d   : > { %968 = vperm.xlu0 %1697, %v1726_v5  }
 0x1a1   : > { %978 = vperm.xlu1 %1698, %v1728_v13  }
 0x1a2   : > { %973 = vperm.xlu2 %1699, %v1730_v58  }
 0x1a5   : > { %983 = vperm.xlu0 %1697, %v1732_v14  }
 0x1aa   : > { %v805_v24 = vpop.permute.xlu1 %804 }
 0x1ab   : > { %v850_v42 = vsub.f32 %v2058_v52, %v805_v24 }
 0x1ad   : > { %v874_v47 = vmul.f32 1.442695, %v850_v42 }
 0x1af   : > { %1733 = vpow2.f32 %v874_v47 }
 0x1b2   : > { %v785_v4 = vpop.permute.xlu1 %784 }
 0x1b3   : > { %v846_v7 = vsub.f32 %v2067_v62, %v785_v4  ;;  %v825_v8 = vpop.permute.xlu2 %824  ;;  %v765_v6 = vpop.permute.xlu0 %764 }
 0x1b4   : > { %v854_v10 = vsub.f32 %v2103_v59, %v825_v8  ;;  %v842_v11 = vsub.f32 %v2072_v1, %v765_v6 }
 0x1b5   : > { %v1734_v25 = vpop.eup %1733  ;;  %v866_v28 = vmul.f32 1.442695, %v846_v7 }
 0x1b6   : > { %v882_v31 = vmul.f32 1.442695, %v854_v10  ;;  %v858_v2 = vmul.f32 1.442695, %v842_v11  ;;  %1058 = vmatmul.f32.vlgmr.msra.gmra.mxu2 %v1734_v25  ;;  %v898_v25 = vld [vmem:[#allocation3 + $0x40] sm:$0xff] }
 0x1b7   : > { %1735 = vpow2.f32 %v866_v28 }
 0x1b8   : > { %1737 = vpow2.f32 %v882_v31  ;;  %v894_v31 = vld [vmem:[#allocation3 + $0x20] sm:$0xff] }
 0x1b9   : > { %1739 = vpow2.f32 %v858_v2 }
 0x1bc   : > { %v830_v52 = vpop.permute.xlu2 %829 }
 0x1bd   : > { %v1736_v17 = vpop.eup %1735  ;;  %v855_v18 = vsub.f32 %v2132_v33, %v830_v52  ;;  %v890_v52 = vld [vmem:[#allocation3] sm:$0xff] }
 0x1be   : > { %v1738_v21 = vpop.eup %1737  ;;  %1046 = vmatmul.f32.vlgmr.msra.gmra.mxu1 %v1736_v17 }
 0x1bf   : > { %v1740_v62 = vpop.eup %1739  ;;  %v884_v54 = vmul.f32 1.442695, %v855_v18  ;;  %1070 = vmatmul.f32.vlgmr.msra.gmra.mxu3 %v1738_v21 }
 0x1c0   : > { %1034 = vmatmul.f32.vlgmr.msra.gmra.mxu0 %v1740_v62 }
 0x1c1   : > { %1741 = vpow2.f32 %v884_v54 }
 0x1c4   : > { %v815_v59 = vpop.permute.xlu2 %814 }
 0x1c5   : > { %v852_v22 = vsub.f32 %v2156_v63, %v815_v59 }
 0x1c7   : > { %v1742_v1 = vpop.eup %1741  ;;  %v878_v36 = vmul.f32 1.442695, %v852_v22 }
 0x1c8   : > { %1073 = vmatmul.f32.gmra.mxu3 %v1742_v1 }
 0x1cb   : > { %v810_v27 = vpop.permute.xlu0 %809 }
 0x1cc   : > { %v851_v29 = vsub.f32 %v2105_v61, %v810_v27  ;;  %v795_v23 = vpop.permute.xlu2 %794 }
 0x1cd   : > { %v848_v61 = vsub.f32 %v2170_v16, %v795_v23 }
 0x1ce   : > { %v876_v20 = vmul.f32 1.442695, %v851_v29  ;;  %v902_v29 = vld [vmem:[#allocation3 + $0x60] sm:$0xff] }
 0x1cf   : > { %v870_v41 = vmul.f32 1.442695, %v848_v61  ;;  %v891_v61 = vld [vmem:[#allocation3 + $0x8] sm:$0xff] }
 0x1d0   : > { %1743 = vpow2.f32 %v876_v20 }
 0x1d1   : > { %1745 = vpow2.f32 %v878_v36 }
 0x1d3   : > { %v770_v33 = vpop.permute.xlu1 %769  ;;  %v790_v30 = vpop.permute.xlu0 %789 }
 0x1d4   : > { %v843_v60 = vsub.f32 %v2130_v32, %v770_v33  ;;  %v847_v38 = vsub.f32 %v2127_v26, %v790_v30  ;;  %v780_v40 = vpop.permute.xlu2 %779  ;;  %v903_v30 = vld [vmem:[#allocation3 + $0x68] sm:$0xff] }
 0x1d5   : > { %v845_v48 = vsub.f32 %v2177_v19, %v780_v40 }
 0x1d6   : > { %v1744_v55 = vpop.eup %1743  ;;  %v860_v3 = vmul.f32 1.442695, %v843_v60  ;;  %v868_v34 = vmul.f32 1.442695, %v847_v38 }
 0x1d7   : > { %1061 = vmatmul.f32.gmra.mxu2 %v1744_v55  ;;  %v1746_v37 = vpop.eup %1745  ;;  %v864_v16 = vmul.f32 1.442695, %v845_v48 }
 0x1d8   : > { %1747 = vpow2.f32 %v860_v3 }
 0x1d9   : > { %1749 = vpow2.f32 %v868_v34  ;;  %v899_v34 = vld [vmem:[#allocation3 + $0x48] sm:$0xff] }
 0x1db   : > { %v835_v39 = vpop.permute.xlu1 %834  ;;  %v775_v63 = vpop.permute.xlu0 %774 }
 0x1dc   : > { %v856_v45 = vsub.f32 %v2152_v57, %v835_v39  ;;  %v844_v43 = vsub.f32 %v2149_v35, %v775_v63  ;;  %v914_v47 = vpop.permute.xlu2 %913  ;;  %v895_v63 = vld [vmem:[#allocation3 + $0x28] sm:$0xff] }
 0x1de   : > { %v1748_v32 = vpop.eup %1747  ;;  %v886_v26 = vmul.f32 1.442695, %v856_v45  ;;  %v862_v46 = vmul.f32 1.442695, %v844_v43  ;;  %v987_v45 = vmul.f32 %v914_v47, %v891_v61 }
 0x1df   : > { %1037 = vmatmul.f32.gmra.mxu0 %v1748_v32  ;;  %1064 = vmatmul.f32.gmra.mxu2 %v1746_v37  ;;  %v1750_v49 = vpop.eup %1749 }
 0x1e0   : > { %1751 = vpow2.f32 %v886_v26  ;;  %1049 = vmatmul.f32.gmra.mxu1 %v1750_v49 }
 0x1e1   : > { %1753 = vpow2.f32 %v862_v46  ;;  %v900_v46 = vld [vmem:[#allocation3 + $0x50] sm:$0xff] }
 0x1e2   : > { %1755 = vpow2.f32 %v870_v41 }
 0x1e3   : > { %v820_v53 = vpop.permute.xlu1 %819  ;;  %v840_v0 = vpop.permute.xlu0 %839  ;;  %1757 = vpow2.f32 %v864_v16  ;;  %v892_v16 = vld [vmem:[#allocation3 + $0x10] sm:$0xff] }
 0x1e4   : > { %v853_v57 = vsub.f32 %v2165_v12, %v820_v53  ;;  %v857_v35 = vsub.f32 %v2167_v15, %v840_v0  ;;  %v929_v8 = vpop.permute.xlu2 %928  ;;  %v896_v0 = vld [vmem:[#allocation3 + $0x30] sm:$0xff] }
 0x1e5   : > { %v990_v18 = vmul.f32 %v929_v8, %v894_v31 }
 0x1e6   : > { %v1752_v51 = vpop.eup %1751  ;;  %v880_v44 = vmul.f32 1.442695, %v853_v57  ;;  %v888_v50 = vmul.f32 1.442695, %v857_v35 }
 0x1e7   : > { %v1754_v56 = vpop.eup %1753  ;;  %1076 = vmatmul.f32.gmra.mxu3 %v1752_v51 }
 0x1e8   : > { %v1756_v19 = vpop.eup %1755  ;;  %1759 = vpow2.f32 %v880_v44  ;;  %1040 = vmatmul.f32.gmra.mxu0 %v1754_v56  ;;  %v904_v56 = vld [vmem:[#allocation3 + $0x70] sm:$0xff] }
 0x1e9   : > { %1761 = vpow2.f32 %v888_v50  ;;  %1052 = vmatmul.f32.gmra.mxu1 %v1756_v19  ;;  %v1758_v58 = vpop.eup %1757 }
 0x1eb   : > { %v800_v5 = vpop.permute.xlu1 %799  ;;  %v909_v42 = vpop.permute.xlu0 %908 }
 0x1ec   : > { %v849_v13 = vsub.f32 %v2174_v9, %v800_v5  ;;  %v2334_v11 = vpop.permute.xlu2 %943  ;;  %v986_v54 = vmul.f32 %v909_v42, %v890_v52 }
 0x1ee   : > { %v1760_v14 = vpop.eup %1759  ;;  %v872_v24 = vmul.f32 1.442695, %v849_v13 }
 0x1ef   : > { %v1762_v12 = vpop.eup %1761  ;;  %1067 = vmatmul.f32.gmra.mxu2 %v1760_v14  ;;  %v893_v14 = vld [vmem:[#allocation3 + $0x18] sm:$0xff] }
 0x1f0   : > { %1763 = vpow2.f32 %v872_v24  ;;  %1043 = vmatmul.f32.gmra.mxu0 %v1758_v58  ;;  %1079 = vmatmul.f32.gmra.mxu3 %v1762_v12 }
 0x1f3   : > { %v919_v7 = vpop.permute.xlu1 %918 }
 0x1f4   : > { %v959_v59 = vpop.permute.xlu2 %958  ;;  %v988_v51 = vmul.f32 %v919_v7, %v892_v16  ;;  %v901_v7 = vld [vmem:[#allocation3 + $0x58] sm:$0xff] }
 0x1f5   : > { %v996_v53 = vmul.f32 %v959_v59, %v900_v46 }
 0x1f6   : > { %v1764_v15 = vpop.eup %1763 }
 0x1f7   : > { %1055 = vmatmul.f32.gmra.mxu1 %v1764_v15  ;;  %v2332_v4 = vpop.permute.xlu0 %923 }
 0x1f8   : > { %v989_v42 = vmul.f32 %v2332_v4, %v893_v14 }
 0x1fb   : > { %v934_v10 = vpop.permute.xlu1 %933 }
 0x1fc   : > { %v974_v60 = vpop.permute.xlu2 %973  ;;  %v991_v41 = vmul.f32 %v934_v10, %v895_v63 }
 0x1fd   : > { %v999_v38 = vmul.f32 %v974_v60, %v903_v30 }
 0x1ff   : > { %v939_v6 = vpop.permute.xlu0 %938 }
 0x200   : > { %v992_v44 = vmul.f32 %v939_v6, %v896_v0  ;;  %v905_v6 = vld [vmem:[#allocation3 + $0x78] sm:$0xff] }
 0x203   : > { %v949_v28 = vpop.permute.xlu1 %948 }
 0x204   : > { %v994_v2 = vmul.f32 %v949_v28, %v898_v25 }
 0x207   : > { %v954_v9 = vpop.permute.xlu0 %953 }
 0x208   : > { %v995_v39 = vmul.f32 %v954_v9, %v899_v34  ;;  %v897_v9 = vld [vmem:[#allocation3 + $0x38] sm:$0xff] }
 0x20b   : > { %v964_v37 = vpop.permute.xlu1 %963 }
 0x20c   : > { %v997_v25 = vmul.f32 %v964_v37, %v901_v7 }
 0x20f   : > { %v969_v20 = vpop.permute.xlu0 %968 }
 0x210   : > { %v998_v23 = vmul.f32 %v969_v20, %v902_v29 }
 0x213   : > { %v979_v19 = vpop.permute.xlu1 %978 }
 0x214   : > { %v1000_v24 = vmul.f32 %v979_v19, %v904_v56 }
 0x217   : > { %v984_v10 = vpop.permute.xlu0 %983 }
 0x218   : > { %v1001_v28 = vmul.f32 %v984_v10, %v905_v6 }
 0x239   : > { %v1059_v17 = vpop.f32.mrf.mxu2 }
 0x23a   : > { %v1091_v21 = vadd.f32 %v1059_v17, %v994_v2  ;;  %v993_v2 = vmul.f32 %v2334_v11, %v897_v9 }
 0x23b   : > { %v1047_v62 = vpop.f32.mrf.mxu1 }
 0x23c   : > { %1108 = vst.msk [vmem:[#allocation3 + $0x40] sm:$0xff] %vm1099_vm7, %v1091_v21  ;;  %v1087_v1 = vadd.f32 %v1047_v62, %v990_v18 }
 0x23d   : > { %v1035_v27 = vpop.f32.mrf.mxu0 }
 0x23e   : > { %v1083_v22 = vadd.f32 %v1035_v27, %v986_v54  ;;  %1104 = vst.msk [vmem:[#allocation3 + $0x20] sm:$0xff] %vm1099_vm7, %v1087_v1 }
 0x240   : > { %1100 = vst.msk [vmem:[#allocation3] sm:$0xff] %vm1099_vm7, %v1083_v22 }
 0x242   : > { %v1071_v36 = vpop.f32.mrf.mxu3 }
 0x243   : > { %v1095_v33 = vadd.f32 %v1071_v36, %v998_v23 }
 0x245   : > { %1112 = vst.msk [vmem:[#allocation3 + $0x60] sm:$0xff] %vm1099_vm7, %v1095_v33 }
 0x24b   : > { %v1074_v55 = vpop.f32.mrf.mxu3 }
 0x24c   : > { %v1096_v3 = vadd.f32 %v1074_v55, %v999_v38 }
 0x24e   : > { %1113 = vst.msk [vmem:[#allocation3 + $0x68] sm:$0xff] %vm1099_vm7, %v1096_v3 }
 0x25a   : > { %v1062_v40 = vpop.f32.mrf.mxu2 }
 0x25b   : > { %v1092_v43 = vadd.f32 %v1062_v40, %v995_v39 }
 0x25c   : > { %v1038_v32 = vpop.f32.mrf.mxu0 }
 0x25d   : > { %1109 = vst.msk [vmem:[#allocation3 + $0x48] sm:$0xff] %vm1099_vm7, %v1092_v43  ;;  %v1084_v26 = vadd.f32 %v1038_v32, %v987_v45  ;;  %v1050_v48 = vpop.f32.mrf.mxu1 }
 0x25e   : > { %v1088_v49 = vadd.f32 %v1050_v48, %v991_v41 }
 0x25f   : > { %1101 = vst.msk [vmem:[#allocation3 + $0x8] sm:$0xff] %vm1099_vm7, %v1084_v26 }
 0x260   : > { %1105 = vst.msk [vmem:[#allocation3 + $0x28] sm:$0xff] %vm1099_vm7, %v1088_v49 }
 0x262   : > { %v1065_v57 = vpop.f32.mrf.mxu2 }
 0x263   : > { %v1093_v35 = vadd.f32 %v1065_v57, %v996_v53 }
 0x265   : > { %1110 = vst.msk [vmem:[#allocation3 + $0x50] sm:$0xff] %vm1099_vm7, %v1093_v35  ;;  %v1041_v50 = vpop.f32.mrf.mxu0 }
 0x266   : > { %v1085_v5 = vadd.f32 %v1041_v50, %v988_v51  ;;  %v1053_v13 = vpop.f32.mrf.mxu1 }
 0x267   : > { %v1089_v58 = vadd.f32 %v1053_v13, %v992_v44 }
 0x268   : > { %1102 = vst.msk [vmem:[#allocation3 + $0x10] sm:$0xff] %vm1099_vm7, %v1085_v5 }
 0x269   : > { %1106 = vst.msk [vmem:[#allocation3 + $0x30] sm:$0xff] %vm1099_vm7, %v1089_v58 }
 0x26a   : > { %v1077_v12 = vpop.f32.mrf.mxu3 }
 0x26b   : > { %v1097_v15 = vadd.f32 %v1077_v12, %v1000_v24 }
 0x26d   : > { %1114 = vst.msk [vmem:[#allocation3 + $0x70] sm:$0xff] %vm1099_vm7, %v1097_v15  ;;  %v1044_v47 = vpop.f32.mrf.mxu0 }
 0x26e   : > { %v1086_v8 = vadd.f32 %v1044_v47, %v989_v42 }
 0x270   : > { %1103 = vst.msk [vmem:[#allocation3 + $0x18] sm:$0xff] %vm1099_vm7, %v1086_v8 }
 0x272   : > { %v1068_v31 = vpop.f32.mrf.mxu2 }
 0x273   : > { %v1094_v52 = vadd.f32 %v1068_v31, %v997_v25  ;;  %v1080_v17 = vpop.f32.mrf.mxu3  ;;  %1136 = sbr.rel (%p1584_p0) target bundleno = 923 (0x39b), region = 82 }
 0x274   : > { %v1098_v18 = vadd.f32 %v1080_v17, %v1001_v28  ;;  %v1056_v21 = vpop.f32.mrf.mxu1 }
 0x275   : > { %1111 = vst.msk [vmem:[#allocation3 + $0x58] sm:$0xff] %vm1099_vm7, %v1094_v52  ;;  %v1090_v4 = vadd.f32 %v1056_v21, %v993_v2 }
 0x276   : > { %1115 = vst.msk [vmem:[#allocation3 + $0x78] sm:$0xff] %vm1099_vm7, %v1098_v18 }
 0x277   : > { %1107 = vst.msk [vmem:[#allocation3 + $0x38] sm:$0xff] %vm1099_vm7, %v1090_v4 }
 0x278   : > { %v2355_v62 = vld [vmem:[#allocation3 + $0x10] sm:$0xff]  ;;  %v2357_v54 = vld [vmem:[#allocation3] sm:$0xff]  ;;  %v2359_v1 = vld [vmem:[#allocation3 + $0x18] sm:$0xff] }
 0x279   : > { %v1155_v11 = vadd.f32 1e-16, %v2355_v62  ;;  %v1153_v59 = vadd.f32 1e-16, %v2357_v54  ;;  %v1156_v27 = vadd.f32 1e-16, %v2359_v1 }
 0x27a   : > { %v2364_v29 = vld [vmem:[#allocation3 + $0x8] sm:$0xff]  ;;  %v2369_v23 = vld [vmem:[#allocation3 + $0x20] sm:$0xff]  ;;  %v2371_v36 = vld [vmem:[#allocation3 + $0x30] sm:$0xff] }
 0x27b   : > { %1768 = vrcp.f32 %v1155_v11  ;;  %v1154_v20 = vadd.f32 1e-16, %v2364_v29  ;;  %v1157_v33 = vadd.f32 1e-16, %v2369_v23  ;;  %v1159_v60 = vadd.f32 1e-16, %v2371_v36 }
 0x27c   : > { %1770 = vrcp.f32 %v1153_v59  ;;  %v2376_v55 = vld [vmem:[#allocation3 + $0x28] sm:$0xff]  ;;  %v2379_v40 = vld [vmem:[#allocation3 + $0x50] sm:$0xff]  ;;  %v2387_v44 = vld [vmem:[#allocation3 + $0x40] sm:$0xff] }
 0x27d   : > { %1772 = vrcp.f32 %v1156_v27  ;;  %v1158_v61 = vadd.f32 1e-16, %v2376_v55  ;;  %v2381_v32 = vld [vmem:[#allocation3 + $0x48] sm:$0xff]  ;;  %v1163_v48 = vadd.f32 1e-16, %v2379_v40  ;;  %v2392_v12 = vld [vmem:[#allocation3 + $0x60] sm:$0xff] }
 0x27e   : > { %v2367_v22 = vld [vmem:[#allocation3 + $0x38] sm:$0xff]  ;;  %1774 = vrcp.f32 %v1154_v20  ;;  %v1162_v16 = vadd.f32 1e-16, %v2381_v32  ;;  %v1161_v56 = vadd.f32 1e-16, %v2387_v44  ;;  %v2390_v13 = vld [vmem:[#allocation3 + $0x68] sm:$0xff] }
 0x27f   : > { %v1160_v30 = vadd.f32 1e-16, %v2367_v22  ;;  %1776 = vrcp.f32 %v1157_v33  ;;  %v1166_v7 = vadd.f32 1e-16, %v2390_v13  ;;  %v1165_v6 = vadd.f32 1e-16, %v2392_v12 }
 0x280   : > { %v2399_v31 = vld [vmem:[#allocation3 + $0x58] sm:$0xff]  ;;  %v2402_v21 = vld [vmem:[#allocation3 + $0x70] sm:$0xff] }
 0x281   : > { %v1769_v38 = vpop.eup %1768  ;;  %1778 = vrcp.f32 %v1160_v30  ;;  %v1164_v52 = vadd.f32 1e-16, %v2399_v31 }
 0x282   : > { %v1771_v3 = vpop.eup %1770  ;;  %v1187_v34 = vmul.f32 %v1769_v38, %v1155_v11  ;;  %1780 = vrcp.f32 %v1159_v60 }
 0x283   : > { %v1773_v39 = vpop.eup %1772  ;;  %v1185_v63 = vmul.f32 %v1771_v3, %v1153_v59  ;;  %1782 = vrcp.f32 %v1158_v61 }
 0x284   : > { %v1775_v45 = vpop.eup %1774  ;;  %v1203_v43 = vsub.f32 2.0, %v1187_v34  ;;  %v1188_v37 = vmul.f32 %v1773_v39, %v1156_v27  ;;  %1784 = vrcp.f32 %v1163_v48 }
 0x285   : > { %v1201_v41 = vsub.f32 2.0, %v1185_v63  ;;  %v1186_v26 = vmul.f32 %v1775_v45, %v1154_v20  ;;  %v1777_v53 = vpop.eup %1776  ;;  %1786 = vrcp.f32 %v1162_v16  ;;  %v2404_v20 = vld [vmem:[#allocation3 + $0x78] sm:$0xff] }
 0x286   : > { %v1219_v46 = vmul.f32 %v1769_v38, %v1203_v43  ;;  %v1204_v0 = vsub.f32 2.0, %v1188_v37  ;;  %v1189_v51 = vmul.f32 %v1777_v53, %v1157_v33  ;;  %1788 = vrcp.f32 %v1161_v56 }
 0x287   : > { %v1217_v49 = vmul.f32 %v1771_v3, %v1201_v41  ;;  %v1779_v57 = vpop.eup %1778  ;;  %v1202_v35 = vsub.f32 2.0, %v1186_v26  ;;  %1790 = vrcp.f32 %v1166_v7  ;;  %v1167_v33 = vadd.f32 1e-16, %v2402_v21 }
 0x288   : > { %1285 = vrot.lane.b32.xlu1 %v1219_v46, %s1859_s17  ;;  %v1781_v50 = vpop.eup %1780  ;;  %v1205_v5 = vsub.f32 2.0, %v1189_v51  ;;  %v1220_v58 = vmul.f32 %v1773_v39, %v1204_v0  ;;  %v1192_v14 = vmul.f32 %v1779_v57, %v1160_v30  ;;  %1792 = vrcp.f32 %v1165_v6 }
 0x289   : > { %1281 = vrot.lane.b32.xlu0 %v1217_v49, %s1859_s17  ;;  %v1783_v19 = vpop.eup %1782  ;;  %v1218_v15 = vmul.f32 %v1775_v45, %v1202_v35  ;;  %v1191_v42 = vmul.f32 %v1781_v50, %v1159_v60  ;;  %1794 = vrcp.f32 %v1164_v52  ;;  %v1168_v3 = vadd.f32 1e-16, %v2404_v20 }
 0x28a   : > { %v1190_v24 = vmul.f32 %v1783_v19, %v1158_v61  ;;  %v1221_v47 = vmul.f32 %v1777_v53, %v1205_v5  ;;  %v1785_v10 = vpop.eup %1784  ;;  %v1208_v9 = vsub.f32 2.0, %v1192_v14  ;;  %1796 = vrcp.f32 %v1167_v33 }
 0x28b   : > { %v1787_v25 = vpop.eup %1786  ;;  %v1207_v28 = vsub.f32 2.0, %v1191_v42  ;;  %v1195_v11 = vmul.f32 %v1785_v10, %v1163_v48  ;;  %1798 = vrcp.f32 %v1168_v3  ;;  %v1860_v14 = vmov 0  }
 0x28c   : > { %1289 = vrot.lane.b32.xlu2 %v1221_v47, %s1859_s17  ;;  %v1206_v8 = vsub.f32 2.0, %v1190_v24  ;;  %v1789_v2 = vpop.eup %1788  ;;  %v1224_v4 = vmul.f32 %v1779_v57, %v1208_v9  ;;  %v1194_v27 = vmul.f32 %v1787_v25, %v1162_v16  ;;  %1767 = vset.pattern.permute.xlu0 %v1860_v14  ;;  %v1235_v24 = vld [vmem:[#allocation2 + $0x10] sm:$0xff]  ;;  %v1234_v9 = vld [vmem:[#allocation2 + $0x8] sm:$0xff] }
 0x28d   : > { %v1193_v18 = vmul.f32 %v1789_v2, %v1161_v56  ;;  %v1223_v59 = vmul.f32 %v1781_v50, %v1207_v28  ;;  %v1791_v60 = vpop.eup %1790  ;;  %v1211_v38 = vsub.f32 2.0, %v1195_v11  ;;  %1765 = vset.pattern.permute.xlu1 %v1860_v14  ;;  %1766 = vset.pattern.permute.xlu2 %v1860_v14  ;;  %vm1251_vm8 = vcmp.gt.f32.partialorder %v1235_v24, -5e+29  ;;  %v1237_v11 = vld [vmem:[#allocation2 + $0x20] sm:$0xff] }
 0x28e   : > { %v1222_v17 = vmul.f32 %v1783_v19, %v1206_v8  ;;  %v1793_v34 = vpop.eup %1792  ;;  %v1210_v61 = vsub.f32 2.0, %v1194_v27  ;;  %v1198_v37 = vmul.f32 %v1791_v60, %v1166_v7  ;;  %vm1250_vm11 = vcmp.gt.f32.partialorder %v1234_v9, -5e+29 }
 0x28f   : > { %v1209_v30 = vsub.f32 2.0, %v1193_v18  ;;  %v1795_v39 = vpop.eup %1794  ;;  %v1227_v43 = vmul.f32 %v1785_v10, %v1211_v38  ;;  %v1197_v26 = vmul.f32 %v1793_v34, %v1165_v6  ;;  %v1236_v10 = vld [vmem:[#allocation2 + $0x18] sm:$0xff]  ;;  %v1238_v18 = vld [vmem:[#allocation2 + $0x28] sm:$0xff]  ;;  %vm1253_vm14 = vcmp.gt.f32.partialorder %v1237_v11, -5e+29 }
 0x290   : > { %1287 = vrot.lane.b32.xlu1 %v1220_v58, %s1859_s17  ;;  %v1196_v45 = vmul.f32 %v1795_v39, %v1164_v52  ;;  %v1226_v41 = vmul.f32 %v1787_v25, %v1210_v61  ;;  %v1797_v48 = vpop.eup %1796  ;;  %v1214_v49 = vsub.f32 2.0, %v1198_v37  ;;  %vm1252_vm10 = vcmp.gt.f32.partialorder %v1236_v10, -5e+29  ;;  %v1243_v61 = vld [vmem:[#allocation2 + $0x50] sm:$0xff] }
 0x291   : > { %1283 = vrot.lane.b32.xlu0 %v1218_v15, %s1859_s17  ;;  %v1225_v63 = vmul.f32 %v1789_v2, %v1209_v30  ;;  %v1213_v16 = vsub.f32 2.0, %v1197_v26  ;;  %v1799_v53 = vpop.eup %1798  ;;  %v1199_v57 = vmul.f32 %v1797_v48, %v1167_v33  ;;  %v1233_v15 = vld [vmem:[#allocation2] sm:$0xff]  ;;  %vm1254_vm12 = vcmp.gt.f32.partialorder %v1238_v18, -5e+29  ;;  %v1242_v26 = vld [vmem:[#allocation2 + $0x48] sm:$0xff] }
 0x292   : > { %v1212_v46 = vsub.f32 2.0, %v1196_v45  ;;  %v1230_v35 = vmul.f32 %v1791_v60, %v1214_v49  ;;  %v1200_v50 = vmul.f32 %v1799_v53, %v1168_v3  ;;  %vm1249_vm9 = vcmp.gt.f32.partialorder %v1233_v15, -5e+29  ;;  %v1241_v3 = vld [vmem:[#allocation2 + $0x40] sm:$0xff] }
 0x293   : > { %v1229_v51 = vmul.f32 %v1793_v34, %v1213_v16  ;;  %v1215_v56 = vsub.f32 2.0, %v1199_v57  ;;  %v1239_v34 = vld [vmem:[#allocation2 + $0x30] sm:$0xff]  ;;  %vm1257_vm15 = vcmp.gt.f32.partialorder %v1241_v3, -5e+29  ;;  %vm1259_vm1 = vcmp.gt.f32.partialorder %v1243_v61, -5e+29 }
 0x294   : > { %1291 = vrot.lane.b32.xlu2 %v1222_v17, %s1859_s17  ;;  %v1228_v0 = vmul.f32 %v1795_v39, %v1212_v46  ;;  %v1216_v19 = vsub.f32 2.0, %v1200_v50  ;;  %vm1255_vm0 = vcmp.gt.f32.partialorder %v1239_v34, -5e+29  ;;  %vm1258_vm3 = vcmp.gt.f32.partialorder %v1242_v26, -5e+29  ;;  %v1247_v57 = vld [vmem:[#allocation2 + $0x70] sm:$0xff] }
 0x295   : > { %v1231_v5 = vmul.f32 %v1797_v48, %v1215_v56  ;;  %v1246_v48 = vld [vmem:[#allocation2 + $0x68] sm:$0xff]  ;;  %vm1263_vm5 = vcmp.gt.f32.partialorder %v1247_v57, -5e+29 }
 0x296   : > { %v1232_v58 = vmul.f32 %v1799_v53, %v1216_v19  ;;  %vm1262_vm4 = vcmp.gt.f32.partialorder %v1246_v48, -5e+29 }
 0x298   : > { %1295 = vrot.lane.b32.xlu1 %v1224_v4, %s1859_s17  ;;  %v1240_v4 = vld [vmem:[#allocation2 + $0x38] sm:$0xff] }
 0x299   : > { %1293 = vrot.lane.b32.xlu0 %v1223_v59, %s1859_s17  ;;  %vm1256_vm13 = vcmp.gt.f32.partialorder %v1240_v4, -5e+29 }
 0x29c   : > { %1297 = vrot.lane.b32.xlu2 %v1225_v63, %s1859_s17 }
 0x2a0   : > { %1301 = vrot.lane.b32.xlu1 %v1227_v43, %s1859_s17 }
 0x2a1   : > { %1299 = vrot.lane.b32.xlu0 %v1226_v41, %s1859_s17  ;;  %v1244_v41 = vld [vmem:[#allocation2 + $0x58] sm:$0xff] }
 0x2a2   : > { %vm1260_vm2 = vcmp.gt.f32.partialorder %v1244_v41, -5e+29 }
 0x2a4   : > { %1303 = vrot.lane.b32.xlu2 %v1228_v0, %s1859_s17 }
 0x2a8   : > { %1307 = vrot.lane.b32.xlu1 %v1230_v35, %s1859_s17  ;;  %v1245_v35 = vld [vmem:[#allocation2 + $0x60] sm:$0xff] }
 0x2a9   : > { %1305 = vrot.lane.b32.xlu0 %v1229_v51, %s1859_s17  ;;  %vm1261_vm6 = vcmp.gt.f32.partialorder %v1245_v35, -5e+29 }
 0x2ac   : > { %1309 = vrot.lane.b32.xlu2 %v1231_v5, %s1859_s17  ;;  %v1248_v5 = vld [vmem:[#allocation2 + $0x78] sm:$0xff] }
 0x2ad   : > { %vm1264_vm7 = vcmp.gt.f32.partialorder %v1248_v5, -5e+29 }
 0x2b1   : > { %1311 = vrot.lane.b32.xlu0 %v1232_v58, %s1859_s17 }
 0x2e6   : > { %v1290_v42 = vpop.permute.xlu2 %1289 }
 0x2e7   : > { %v1333_v38 = vsel %vm1253_vm14, %v1290_v42, 0.0 }
 0x2ee   : > { %v1292_v25 = vpop.permute.xlu2 %1291 }
 0x2ef   : > { %v1334_v59 = vsel %vm1254_vm12, %v1292_v25, 0.0 }
 0x2f6   : > { %v1298_v30 = vpop.permute.xlu2 %1297 }
 0x2f7   : > { %v1337_v39 = vsel %vm1257_vm15, %v1298_v30, 0.0 }
 0x2fa   : > { %v1286_v47 = vpop.permute.xlu1 %1285 }
 0x2fb   : > { %v1331_v7 = vsel %vm1251_vm8, %v1286_v47, 0.0  ;;  %v1282_v8 = vpop.permute.xlu0 %1281  ;;  %vm1441_vm8 = vcmask 261120  }
 0x2fc   : > { %v1329_v6 = vsel %vm1249_vm9, %v1282_v8, 0.0  ;;  %1357 = vperm.xlu0 %1767, %v1331_v7  }
 0x2fd   : > { %1347 = vperm.xlu1 %1765, %v1329_v6  }
 0x2fe   : > { %v1304_v46 = vpop.permute.xlu2 %1303 }
 0x2ff   : > { %v1340_v49 = vsel %vm1260_vm2, %v1304_v46, 0.0 }
 0x302   : > { %v1288_v28 = vpop.permute.xlu1 %1287 }
 0x303   : > { %v1332_v2 = vsel %vm1252_vm10, %v1288_v28, 0.0  ;;  %v1284_v52 = vpop.permute.xlu0 %1283 }
 0x304   : > { %v1330_v17 = vsel %vm1250_vm11, %v1284_v52, 0.0 }
 0x305   : > { %1362 = vperm.xlu1 %1765, %v1332_v2   ;;  %1352 = vperm.xlu2 %1766, %v1330_v17  }
 0x306   : > { %v1310_v50 = vpop.permute.xlu2 %1309 }
 0x307   : > { %v1343_v56 = vsel %vm1263_vm5, %v1310_v50, 0.0 }
 0x30a   : > { %v1296_v27 = vpop.permute.xlu1 %1295 }
 0x30b   : > { %v1336_v33 = vsel %vm1256_vm13, %v1296_v27, 0.0  ;;  %v1294_v60 = vpop.permute.xlu0 %1293 }
 0x30c   : > { %1382 = vperm.xlu0 %1767, %v1336_v33   ;;  %v1335_v45 = vsel %vm1255_vm0, %v1294_v60, 0.0 }
 0x30d   : > { %1372 = vperm.xlu1 %1765, %v1334_v59   ;;  %1367 = vperm.xlu2 %1766, %v1333_v38  }
 0x312   : > { %v1302_v63 = vpop.permute.xlu1 %1301 }
 0x313   : > { %v1339_v43 = vsel %vm1259_vm1, %v1302_v63, 0.0  ;;  %v1300_v37 = vpop.permute.xlu0 %1299 }
 0x314   : > { %1397 = vperm.xlu0 %1767, %v1339_v43   ;;  %v1338_v53 = vsel %vm1258_vm3, %v1300_v37, 0.0 }
 0x315   : > { %1387 = vperm.xlu1 %1765, %v1337_v39   ;;  %1377 = vperm.xlu2 %1766, %v1335_v45  }
 0x31a   : > { %v1308_v16 = vpop.permute.xlu1 %1307 }
 0x31b   : > { %v1342_v0 = vsel %vm1262_vm4, %v1308_v16, 0.0  ;;  %v1306_v51 = vpop.permute.xlu0 %1305 }
 0x31c   : > { %1412 = vperm.xlu0 %1767, %v1342_v0   ;;  %v1341_v19 = vsel %vm1261_vm6, %v1306_v51, 0.0 }
 0x31d   : > { %1402 = vperm.xlu1 %1765, %v1340_v49   ;;  %1392 = vperm.xlu2 %1766, %v1338_v53  }
 0x323   : > { %v1312_v58 = vpop.permute.xlu0 %1311 }
 0x324   : > { %v1344_v14 = vsel %vm1264_vm7, %v1312_v58, 0.0 }
 0x325   : > { %1417 = vperm.xlu1 %1765, %v1343_v56   ;;  %1407 = vperm.xlu2 %1766, %v1341_v19  }
 0x32d   : > { %1422 = vperm.xlu2 %1766, %v1344_v14  }
 0x35f   : > { %v1353_v24 = vpop.permute.xlu2 %1352 }
 0x360   : > { %v1426_v15 = vmul.f32 %v1353_v24, %v2364_v29 }
 0x362   : > { %1443 = vst.msk [vmem:[%s1967_s8 + $0x8] sm:$0xff] %vm1441_vm8, %v1426_v15 }
 0x367   : > { %v1368_v42 = vpop.permute.xlu2 %1367 }
 0x368   : > { %v1429_v47 = vmul.f32 %v1368_v42, %v2369_v23 }
 0x36a   : > { %1446 = vst.msk [vmem:[%s1967_s8 + $0x20] sm:$0xff] %vm1441_vm8, %v1429_v47 }
 0x36e   : > { %v1358_v7 = vpop.permute.xlu0 %1357 }
 0x36f   : > { %v1348_v8 = vpop.permute.xlu1 %1347  ;;  %v1378_v6 = vpop.permute.xlu2 %1377  ;;  %v1427_v10 = vmul.f32 %v1358_v7, %v2355_v62 }
 0x370   : > { %v1425_v9 = vmul.f32 %v1348_v8, %v2357_v54  ;;  %v1431_v25 = vmul.f32 %v1378_v6, %v2371_v36 }
 0x371   : > { %1444 = vst.msk [vmem:[%s1967_s8 + $0x10] sm:$0xff] %vm1441_vm8, %v1427_v10 }
 0x372   : > { %1442 = vst.msk [vmem:[%s1967_s8] sm:$0xff] %vm1441_vm8, %v1425_v9 }
 0x373   : > { %1448 = vst.msk [vmem:[%s1967_s8 + $0x30] sm:$0xff] %vm1441_vm8, %v1431_v25 }
 0x377   : > { %v1363_v29 = vpop.permute.xlu1 %1362  ;;  %v1393_v23 = vpop.permute.xlu2 %1392 }
 0x378   : > { %v1428_v28 = vmul.f32 %v1363_v29, %v2359_v1  ;;  %v1434_v2 = vmul.f32 %v1393_v23, %v2381_v32 }
 0x37a   : > { %1445 = vst.msk [vmem:[%s1967_s8 + $0x18] sm:$0xff] %vm1441_vm8, %v1428_v28 }
 0x37b   : > { %1451 = vst.msk [vmem:[%s1967_s8 + $0x48] sm:$0xff] %vm1441_vm8, %v1434_v2 }
 0x37e   : > { %v1383_v62 = vpop.permute.xlu0 %1382 }
 0x37f   : > { %v1373_v54 = vpop.permute.xlu1 %1372  ;;  %v1408_v36 = vpop.permute.xlu2 %1407  ;;  %v1432_v52 = vmul.f32 %v1383_v62, %v2367_v22 }
 0x380   : > { %v1430_v17 = vmul.f32 %v1373_v54, %v2376_v55  ;;  %v1437_v18 = vmul.f32 %v1408_v36, %v2392_v12 }
 0x381   : > { %1449 = vst.msk [vmem:[%s1967_s8 + $0x38] sm:$0xff] %vm1441_vm8, %v1432_v52 }
 0x382   : > { %1447 = vst.msk [vmem:[%s1967_s8 + $0x28] sm:$0xff] %vm1441_vm8, %v1430_v17 }
 0x383   : > { %1454 = vst.msk [vmem:[%s1967_s8 + $0x60] sm:$0xff] %vm1441_vm8, %v1437_v18 }
 0x386   : > { %v1398_v1 = vpop.permute.xlu0 %1397 }
 0x387   : > { %v1388_v32 = vpop.permute.xlu1 %1387  ;;  %v1423_v4 = vpop.permute.xlu2 %1422  ;;  %v1435_v11 = vmul.f32 %v1398_v1, %v2379_v40 }
 0x388   : > { %v1433_v22 = vmul.f32 %v1388_v32, %v2387_v44  ;;  %v1440_v55 = vmul.f32 %v1423_v4, %v2404_v20 }
 0x389   : > { %1452 = vst.msk [vmem:[%s1967_s8 + $0x50] sm:$0xff] %vm1441_vm8, %v1435_v11 }
 0x38a   : > { %1450 = vst.msk [vmem:[%s1967_s8 + $0x40] sm:$0xff] %vm1441_vm8, %v1433_v22 }
 0x38b   : > { %1457 = vst.msk [vmem:[%s1967_s8 + $0x78] sm:$0xff] %vm1441_vm8, %v1440_v55 }
 0x38e   : > { %v1413_v12 = vpop.permute.xlu0 %1412 }
 0x38f   : > { %v1403_v59 = vpop.permute.xlu1 %1402  ;;  %v1438_v27 = vmul.f32 %v1413_v12, %v2390_v13 }
 0x390   : > { %v1436_v33 = vmul.f32 %v1403_v59, %v2399_v31 }
 0x391   : > { %1455 = vst.msk [vmem:[%s1967_s8 + $0x68] sm:$0xff] %vm1441_vm8, %v1438_v27 }
 0x392   : > { %1453 = vst.msk [vmem:[%s1967_s8 + $0x58] sm:$0xff] %vm1441_vm8, %v1436_v33 }
 0x397   : > { %v1418_v40 = vpop.permute.xlu1 %1417 }
 0x398   : > { %v1439_v44 = vmul.f32 %v1418_v40, %v2402_v21 }
 0x39a   : > { %1456 = vst.msk [vmem:[%s1967_s8 + $0x70] sm:$0xff] %vm1441_vm8, %v1439_v44 }
 0x39b PF: > { %s14_s21 = sadd.s32 1, %s1854_s21   ;;  %s2499_s15 = smov %s1834_s16 }
 0x39c   : > { %p11_p1 = scmp.ge.s32.totalorder %s14_s21, 6   ;;  %s2500_s16 = smov %s1937_s28 }
 0x39d   : > { %s2501_s17 = smov %s1846_s19  ;;  %s2502_s18 = smov %s1850_s20 }
 0x39e   : > { %s2503_s19 = smov %s2506_s22  ;;  %s2504_s20 = smov %s2510_s23 }
 0x39f   :  { %13 = sbr.rel (!%p11_p1) target bundleno = 4 (0x4), region = 126 }

</bundles_post_ra>
